<compile_context>
chip_gen: v7x
topology: tpu7x:2x2x1
jax: 0.10.0
libtpu: 0.0.40
codegen_flags: <defaults>
</compile_context>

<pallas_src>
import functools

import jax
import jax.numpy as jnp
from jax import lax
from jax.experimental import pallas as pl
from jax.experimental.pallas import tpu as pltpu

EPS = 1e-5


# ---------------------------------------------------------------------------
# Kernel bodies
# ---------------------------------------------------------------------------
def _conv_affine_kernel(x_ref, w_ref, s_ref, b_ref, o_ref, *, K, Wp, Lext):
    """K*K-tap dense conv as shifted GEMMs + fused per-channel affine (folded BN).

    x_ref: (1, Lin, Cin)    flattened zero-padded input frame
    w_ref: (K*K, Cin, Cout)
    s_ref, b_ref: (1, Cout) scale / bias precomputed in the wrapper
    o_ref: (1, Lext, Cout)  wide output frame (valid columns sliced in wrapper)
    """
    cout = o_ref.shape[2]
    acc = jnp.zeros((Lext, cout), jnp.float32)
    for kh in range(K):
        for kw in range(K):
            off = kh * Wp + kw
            patch = x_ref[0, off:off + Lext, :]          # (Lext, Cin)
            acc = acc + jnp.dot(patch, w_ref[kh * K + kw],
                                preferred_element_type=jnp.float32)
    o_ref[0] = (acc * s_ref[...] + b_ref[...]).astype(o_ref.dtype)


def _dw_conv_kernel(x_ref, w_ref, b_ref, *rest, K, Wp, Lext,
                    add_residual, apply_relu):
    """Depthwise KxK conv + bias (+ residual) (+ ReLU), all on the VPU.

    x_ref: (1, Lin, C) flattened padded input, w_ref: (K*K, 1, C), b_ref: (1, C)
    optional r_ref: (1, Lext, C) residual in the same wide frame
    o_ref: (1, Lext, C)
    """
    if add_residual:
        r_ref, o_ref = rest
    else:
        (o_ref,) = rest
    c = o_ref.shape[2]
    acc = jnp.zeros((Lext, c), jnp.float32)
    for kh in range(K):
        for kw in range(K):
            off = kh * Wp + kw
            acc = acc + x_ref[0, off:off + Lext, :] * w_ref[kh * K + kw]
    acc = acc + b_ref[...]
    if add_residual:
        acc = acc + r_ref[0]
    if apply_relu:
        acc = jnp.maximum(acc, 0.0)
    o_ref[0] = acc.astype(o_ref.dtype)


# ---------------------------------------------------------------------------
# Wrappers (layout plumbing only: pad / flatten / slice)
# ---------------------------------------------------------------------------
def _wide_frame(x, k):
    """Zero-pad (NHWC) for a KxK SAME stride-1 conv and flatten spatial to rows."""
    n, h, w, c = x.shape
    p = k // 2
    extra = 1 if k > 1 else 0                 # covers the last tap's row overrun
    xp = jnp.pad(x, ((0, 0), (p, p + extra), (p, p), (0, 0)))
    wp = w + 2 * p
    lin = (h + 2 * p + extra) * wp
    return xp.reshape(n, lin, c), wp, lin


def conv2d_affine(x, w_hwio, scale, bias):
    """SAME stride-1 conv (HWIO weights, no conv bias) with fused affine output."""
    n, h, wdim, cin = x.shape
    k = w_hwio.shape[0]
    cout = w_hwio.shape[3]
    xf, wp, lin = _wide_frame(x, k)
    lext = h * wp
    wf = w_hwio.reshape(k * k, cin, cout)
    s2 = scale.reshape(1, cout).astype(x.dtype)
    b2 = bias.reshape(1, cout).astype(x.dtype)
    kern = functools.partial(_conv_affine_kernel, K=k, Wp=wp, Lext=lext)
    out = pl.pallas_call(
        kern,
        out_shape=jax.ShapeDtypeStruct((n, lext, cout), x.dtype),
        grid=(n,),
        in_specs=[
            pl.BlockSpec((1, lin, cin), lambda i: (i, 0, 0)),
            pl.BlockSpec((k * k, cin, cout), lambda i: (0, 0, 0)),
            pl.BlockSpec((1, cout), lambda i: (0, 0)),
            pl.BlockSpec((1, cout), lambda i: (0, 0)),
        ],
        out_specs=pl.BlockSpec((1, lext, cout), lambda i: (i, 0, 0)),
        compiler_params=pltpu.CompilerParams(
            dimension_semantics=("parallel",)),
    )(xf, wf, s2, b2)
    return out.reshape(n, h, wp, cout)[:, :, :wdim, :]


def depthwise_conv_fused(x, w_dw, bias, *, residual=None, relu=False):
    """Depthwise KxK conv + bias (+ residual add) (+ ReLU). w_dw: (K, K, 1, C)."""
    n, h, wdim, c = x.shape
    k = w_dw.shape[0]
    xf, wp, lin = _wide_frame(x, k)
    lext = h * wp
    wf = w_dw.reshape(k * k, 1, c)
    b2 = bias.reshape(1, c).astype(x.dtype)
    in_specs = [
        pl.BlockSpec((1, lin, c), lambda i: (i, 0, 0)),
        pl.BlockSpec((k * k, 1, c), lambda i: (0, 0, 0)),
        pl.BlockSpec((1, c), lambda i: (0, 0)),
    ]
    args = [xf, wf, b2]
    if residual is not None:
        rf = jnp.pad(residual, ((0, 0), (0, 0), (0, wp - wdim), (0, 0)))
        rf = rf.reshape(n, lext, c)
        in_specs.append(pl.BlockSpec((1, lext, c), lambda i: (i, 0, 0)))
        args.append(rf)
    kern = functools.partial(_dw_conv_kernel, K=k, Wp=wp, Lext=lext,
                             add_residual=residual is not None,
                             apply_relu=relu)
    out = pl.pallas_call(
        kern,
        out_shape=jax.ShapeDtypeStruct((n, lext, c), x.dtype),
        grid=(n,),
        in_specs=in_specs,
        out_specs=pl.BlockSpec((1, lext, c), lambda i: (i, 0, 0)),
        compiler_params=pltpu.CompilerParams(
            dimension_semantics=("parallel",)),
    )(*args)
    return out.reshape(n, h, wp, c)[:, :, :wdim, :]


def en_basic_forward(x_nchw, prm, *, stride=1, is_shortcut=False):
    """Pallas forward of EnBasic (NCHW in / NCHW out, like the PyTorch module)."""
    # TODO(synk): BatchNorm is folded in inference mode with given (running)
    # statistics; training-mode batch statistics would be computed in the wrapper
    # and folded into the same per-channel scale/bias.
    x = jnp.transpose(x_nchw, (0, 2, 3, 1))               # NHWC, channels in lanes

    # ConvEnBn2d #1: conv3x3(stride) -> BN(no affine) -> dwconv3x3(+bias); ReLU
    s1 = 1.0 / jnp.sqrt(prm['bn1_var'] + EPS)             # exact scale/bias, computed
    b1 = -prm['bn1_mean'] * s1                            # once in the wrapper
    t = conv2d_affine(x, prm['w1'], s1, b1)
    if stride > 1:                                        # stride via subsampling the
        t = t[:, ::stride, ::stride, :]                   # stride-1 SAME conv output
    z = depthwise_conv_fused(t, prm['dw1_w'], prm['dw1_b'], relu=True)

    # ConvEnBn2d #2
    s2 = 1.0 / jnp.sqrt(prm['bn2_var'] + EPS)
    b2 = -prm['bn2_mean'] * s2
    t2 = conv2d_affine(z, prm['w2'], s2, b2)

    # Shortcut branch (ConvBn2d: 1x1 conv + affine BN) or identity
    if is_shortcut:
        ss = prm['sc_gamma'] / jnp.sqrt(prm['sc_var'] + EPS)
        sb = prm['sc_beta'] - prm['sc_mean'] * ss
        xs = conv2d_affine(x, prm['sc_w'], ss, sb)
        if stride > 1:
            xs = xs[:, ::stride, ::stride, :]
    else:
        xs = x if stride == 1 else x[:, ::stride, ::stride, :]

    # Final dwconv fused with bias + residual add + ReLU
    out = depthwise_conv_fused(t2, prm['dw2_w'], prm['dw2_b'],
                               residual=xs, relu=True)
    return jnp.transpose(out, (0, 3, 1, 2))               # back to NCHW


# ---------------------------------------------------------------------------
# Pure-JAX reference (same eval-mode semantics as the PyTorch module)
# ---------------------------------------------------------------------------
def _ref_forward(x_nchw, prm, *, stride=1, is_shortcut=False):
    dn = ('NHWC', 'HWIO', 'NHWC')
    hp = lax.Precision.HIGHEST

    def conv(x, w, s, p):
        return lax.conv_general_dilated(
            x, w, window_strides=(s, s), padding=[(p, p), (p, p)],
            dimension_numbers=dn, precision=hp)

    def dconv(x, w, b):
        c = x.shape[-1]
        y = lax.conv_general_dilated(
            x, w, window_strides=(1, 1), padding=[(1, 1), (1, 1)],
            dimension_numbers=dn, feature_group_count=c, precision=hp)
        return y + b.reshape(1, 1, 1, c)

    def bn(x, mean, var, gamma=None, beta=None):
        y = (x - mean) / jnp.sqrt(var + EPS)
        if gamma is not None:
            y = y * gamma + beta
        return y

    x = jnp.transpose(x_nchw, (0, 2, 3, 1))
    t = bn(conv(x, prm['w1'], stride, 1), prm['bn1_mean'], prm['bn1_var'])
    z = jax.nn.relu(dconv(t, prm['dw1_w'], prm['dw1_b']))
    t = bn(conv(z, prm['w2'], 1, 1), prm['bn2_mean'], prm['bn2_var'])
    t = dconv(t, prm['dw2_w'], prm['dw2_b'])
    if is_shortcut:
        xs = bn(conv(x, prm['sc_w'], stride, 0),
                prm['sc_mean'], prm['sc_var'], prm['sc_gamma'], prm['sc_beta'])
    else:
        xs = x if stride == 1 else x[:, ::stride, ::stride, :]
    out = jax.nn.relu(t + xs)
    return jnp.transpose(out, (0, 3, 1, 2))


if __name__ == "__main__":
    key = jax.random.PRNGKey(0)
    N, Cin, Cmid, Cout, H, W = 2, 32, 32, 32, 16, 16
    ks = jax.random.split(key, 16)
    x = jax.random.normal(ks[0], (N, Cin, H, W), dtype=jnp.float32)

    prm = {
        'w1': 0.1 * jax.random.normal(ks[1], (3, 3, Cin, Cmid), jnp.float32),
        'bn1_mean': 0.1 * jax.random.normal(ks[2], (Cmid,), jnp.float32),
        'bn1_var': jax.random.uniform(ks[3], (Cmid,), jnp.float32, 0.5, 1.5),
        'dw1_w': 0.2 * jax.random.normal(ks[4], (3, 3, 1, Cmid), jnp.float32),
        'dw1_b': 0.1 * jax.random.normal(ks[5], (Cmid,), jnp.float32),
        'w2': 0.1 * jax.random.normal(ks[6], (3, 3, Cmid, Cout), jnp.float32),
        'bn2_mean': 0.1 * jax.random.normal(ks[7], (Cout,), jnp.float32),
        'bn2_var': jax.random.uniform(ks[8], (Cout,), jnp.float32, 0.5, 1.5),
        'dw2_w': 0.2 * jax.random.normal(ks[9], (3, 3, 1, Cout), jnp.float32),
        'dw2_b': 0.1 * jax.random.normal(ks[10], (Cout,), jnp.float32),
        'sc_w': 0.1 * jax.random.normal(ks[11], (1, 1, Cin, Cout), jnp.float32),
        'sc_mean': 0.1 * jax.random.normal(ks[12], (Cout,), jnp.float32),
        'sc_var': jax.random.uniform(ks[13], (Cout,), jnp.float32, 0.5, 1.5),
        'sc_gamma': 1.0 + 0.1 * jax.random.normal(ks[14], (Cout,), jnp.float32),
        'sc_beta': 0.1 * jax.random.normal(ks[15], (Cout,), jnp.float32),
    }

    for shortcut in (True, False):
        out = en_basic_forward(x, prm, stride=1, is_shortcut=shortcut)
        jax.block_until_ready(out)
        ref = _ref_forward(x, prm, stride=1, is_shortcut=shortcut)
        assert out.shape == (N, Cout, H, W)
        err = jnp.max(jnp.abs(out - ref))
        assert jnp.allclose(out, ref, atol=1e-4, rtol=1e-4), (
            f"mismatch vs reference (is_shortcut={shortcut}), max abs err {err}")

    print("KERNEL_OK")
</pallas_src>

<mosaic_0001>
module attributes {stable_mosaic.version = 11 : i64} {
  func.func @_conv_affine_kernel(%arg0: i32, %arg1: memref<1x342x32xf32, #tpu.memory_space<vmem>>, %arg2: memref<9x32x32xf32, #tpu.memory_space<vmem>>, %arg3: memref<1x32xf32, #tpu.memory_space<vmem>>, %arg4: memref<1x32xf32, #tpu.memory_space<vmem>>, %arg5: memref<1x288x32xf32, #tpu.memory_space<vmem>>) attributes {dimension_semantics = [#tpu.dimension_semantics<parallel>], iteration_bounds = array<i64: 2>, scalar_prefetch = 0 : i64, scratch_operands = 0 : i64, tpu.core_type = #tpu.core_type<tc>, window_params = [{transform_indices = @transform_0, window_bounds = array<i64: 1, 342, 32>}, {pipeline_mode = #tpu.pipeline_mode<synchronous>, transform_indices = @transform_1, window_bounds = array<i64: 9, 32, 32>}, {pipeline_mode = #tpu.pipeline_mode<synchronous>, transform_indices = @transform_2, window_bounds = array<i64: 1, 32>}, {pipeline_mode = #tpu.pipeline_mode<synchronous>, transform_indices = @transform_3, window_bounds = array<i64: 1, 32>}, {transform_indices = @transform_4, window_bounds = array<i64: 1, 288, 32>}]} {
    %cst = arith.constant 0.000000e+00 : f32
    %0 = vector.broadcast %cst : f32 to vector<288x32xf32>
    %c0 = arith.constant 0 : index
    %c0_0 = arith.constant 0 : index
    %c0_1 = arith.constant 0 : index
    %1 = vector.load %arg1[%c0, %c0_0, %c0_1] : memref<1x342x32xf32, #tpu.memory_space<vmem>>, vector<1x288x32xf32>
    %2 = vector.shape_cast %1 : vector<1x288x32xf32> to vector<288x32xf32>
    %c0_2 = arith.constant 0 : index
    %c0_3 = arith.constant 0 : index
    %c0_4 = arith.constant 0 : index
    %3 = vector.load %arg2[%c0_2, %c0_3, %c0_4] : memref<9x32x32xf32, #tpu.memory_space<vmem>>, vector<1x32x32xf32>
    %4 = vector.shape_cast %3 : vector<1x32x32xf32> to vector<32x32xf32>
    %cst_5 = arith.constant dense<0.000000e+00> : vector<288x32xf32>
    %5 = tpu.matmul %2, %4, %cst_5 {dimension_numbers = #tpu.dot_dimension_numbers<[1], [0], [0], [1], [0, 0, 1, 1], [], []>} : vector<288x32xf32>, vector<32x32xf32>, vector<288x32xf32> -> vector<288x32xf32>
    %6 = arith.addf %0, %5 : vector<288x32xf32>
    %c0_6 = arith.constant 0 : index
    %c1 = arith.constant 1 : index
    %c0_7 = arith.constant 0 : index
    %7 = vector.load %arg1[%c0_6, %c1, %c0_7] : memref<1x342x32xf32, #tpu.memory_space<vmem>>, vector<1x288x32xf32>
    %8 = vector.shape_cast %7 : vector<1x288x32xf32> to vector<288x32xf32>
    %c1_8 = arith.constant 1 : index
    %c0_9 = arith.constant 0 : index
    %c0_10 = arith.constant 0 : index
    %9 = vector.load %arg2[%c1_8, %c0_9, %c0_10] : memref<9x32x32xf32, #tpu.memory_space<vmem>>, vector<1x32x32xf32>
    %10 = vector.shape_cast %9 : vector<1x32x32xf32> to vector<32x32xf32>
    %cst_11 = arith.constant dense<0.000000e+00> : vector<288x32xf32>
    %11 = tpu.matmul %8, %10, %cst_11 {dimension_numbers = #tpu.dot_dimension_numbers<[1], [0], [0], [1], [0, 0, 1, 1], [], []>} : vector<288x32xf32>, vector<32x32xf32>, vector<288x32xf32> -> vector<288x32xf32>
    %12 = arith.addf %6, %11 : vector<288x32xf32>
    %c0_12 = arith.constant 0 : index
    %c2 = arith.constant 2 : index
    %c0_13 = arith.constant 0 : index
    %13 = vector.load %arg1[%c0_12, %c2, %c0_13] : memref<1x342x32xf32, #tpu.memory_space<vmem>>, vector<1x288x32xf32>
    %14 = vector.shape_cast %13 : vector<1x288x32xf32> to vector<288x32xf32>
    %c2_14 = arith.constant 2 : index
    %c0_15 = arith.constant 0 : index
    %c0_16 = arith.constant 0 : index
    %15 = vector.load %arg2[%c2_14, %c0_15, %c0_16] : memref<9x32x32xf32, #tpu.memory_space<vmem>>, vector<1x32x32xf32>
    %16 = vector.shape_cast %15 : vector<1x32x32xf32> to vector<32x32xf32>
    %cst_17 = arith.constant dense<0.000000e+00> : vector<288x32xf32>
    %17 = tpu.matmul %14, %16, %cst_17 {dimension_numbers = #tpu.dot_dimension_numbers<[1], [0], [0], [1], [0, 0, 1, 1], [], []>} : vector<288x32xf32>, vector<32x32xf32>, vector<288x32xf32> -> vector<288x32xf32>
    %18 = arith.addf %12, %17 : vector<288x32xf32>
    %c0_18 = arith.constant 0 : index
    %c18 = arith.constant 18 : index
    %c0_19 = arith.constant 0 : index
    %19 = vector.load %arg1[%c0_18, %c18, %c0_19] : memref<1x342x32xf32, #tpu.memory_space<vmem>>, vector<1x288x32xf32>
    %20 = vector.shape_cast %19 : vector<1x288x32xf32> to vector<288x32xf32>
    %c3 = arith.constant 3 : index
    %c0_20 = arith.constant 0 : index
    %c0_21 = arith.constant 0 : index
    %21 = vector.load %arg2[%c3, %c0_20, %c0_21] : memref<9x32x32xf32, #tpu.memory_space<vmem>>, vector<1x32x32xf32>
    %22 = vector.shape_cast %21 : vector<1x32x32xf32> to vector<32x32xf32>
    %cst_22 = arith.constant dense<0.000000e+00> : vector<288x32xf32>
    %23 = tpu.matmul %20, %22, %cst_22 {dimension_numbers = #tpu.dot_dimension_numbers<[1], [0], [0], [1], [0, 0, 1, 1], [], []>} : vector<288x32xf32>, vector<32x32xf32>, vector<288x32xf32> -> vector<288x32xf32>
    %24 = arith.addf %18, %23 : vector<288x32xf32>
    %c0_23 = arith.constant 0 : index
    %c19 = arith.constant 19 : index
    %c0_24 = arith.constant 0 : index
    %25 = vector.load %arg1[%c0_23, %c19, %c0_24] : memref<1x342x32xf32, #tpu.memory_space<vmem>>, vector<1x288x32xf32>
    %26 = vector.shape_cast %25 : vector<1x288x32xf32> to vector<288x32xf32>
    %c4 = arith.constant 4 : index
    %c0_25 = arith.constant 0 : index
    %c0_26 = arith.constant 0 : index
    %27 = vector.load %arg2[%c4, %c0_25, %c0_26] : memref<9x32x32xf32, #tpu.memory_space<vmem>>, vector<1x32x32xf32>
    %28 = vector.shape_cast %27 : vector<1x32x32xf32> to vector<32x32xf32>
    %cst_27 = arith.constant dense<0.000000e+00> : vector<288x32xf32>
    %29 = tpu.matmul %26, %28, %cst_27 {dimension_numbers = #tpu.dot_dimension_numbers<[1], [0], [0], [1], [0, 0, 1, 1], [], []>} : vector<288x32xf32>, vector<32x32xf32>, vector<288x32xf32> -> vector<288x32xf32>
    %30 = arith.addf %24, %29 : vector<288x32xf32>
    %c0_28 = arith.constant 0 : index
    %c20 = arith.constant 20 : index
    %c0_29 = arith.constant 0 : index
    %31 = vector.load %arg1[%c0_28, %c20, %c0_29] : memref<1x342x32xf32, #tpu.memory_space<vmem>>, vector<1x288x32xf32>
    %32 = vector.shape_cast %31 : vector<1x288x32xf32> to vector<288x32xf32>
    %c5 = arith.constant 5 : index
    %c0_30 = arith.constant 0 : index
    %c0_31 = arith.constant 0 : index
    %33 = vector.load %arg2[%c5, %c0_30, %c0_31] : memref<9x32x32xf32, #tpu.memory_space<vmem>>, vector<1x32x32xf32>
    %34 = vector.shape_cast %33 : vector<1x32x32xf32> to vector<32x32xf32>
    %cst_32 = arith.constant dense<0.000000e+00> : vector<288x32xf32>
    %35 = tpu.matmul %32, %34, %cst_32 {dimension_numbers = #tpu.dot_dimension_numbers<[1], [0], [0], [1], [0, 0, 1, 1], [], []>} : vector<288x32xf32>, vector<32x32xf32>, vector<288x32xf32> -> vector<288x32xf32>
    %36 = arith.addf %30, %35 : vector<288x32xf32>
    %c0_33 = arith.constant 0 : index
    %c36 = arith.constant 36 : index
    %c0_34 = arith.constant 0 : index
    %37 = vector.load %arg1[%c0_33, %c36, %c0_34] : memref<1x342x32xf32, #tpu.memory_space<vmem>>, vector<1x288x32xf32>
    %38 = vector.shape_cast %37 : vector<1x288x32xf32> to vector<288x32xf32>
    %c6 = arith.constant 6 : index
    %c0_35 = arith.constant 0 : index
    %c0_36 = arith.constant 0 : index
    %39 = vector.load %arg2[%c6, %c0_35, %c0_36] : memref<9x32x32xf32, #tpu.memory_space<vmem>>, vector<1x32x32xf32>
    %40 = vector.shape_cast %39 : vector<1x32x32xf32> to vector<32x32xf32>
    %cst_37 = arith.constant dense<0.000000e+00> : vector<288x32xf32>
    %41 = tpu.matmul %38, %40, %cst_37 {dimension_numbers = #tpu.dot_dimension_numbers<[1], [0], [0], [1], [0, 0, 1, 1], [], []>} : vector<288x32xf32>, vector<32x32xf32>, vector<288x32xf32> -> vector<288x32xf32>
    %42 = arith.addf %36, %41 : vector<288x32xf32>
    %c0_38 = arith.constant 0 : index
    %c37 = arith.constant 37 : index
    %c0_39 = arith.constant 0 : index
    %43 = vector.load %arg1[%c0_38, %c37, %c0_39] : memref<1x342x32xf32, #tpu.memory_space<vmem>>, vector<1x288x32xf32>
    %44 = vector.shape_cast %43 : vector<1x288x32xf32> to vector<288x32xf32>
    %c7 = arith.constant 7 : index
    %c0_40 = arith.constant 0 : index
    %c0_41 = arith.constant 0 : index
    %45 = vector.load %arg2[%c7, %c0_40, %c0_41] : memref<9x32x32xf32, #tpu.memory_space<vmem>>, vector<1x32x32xf32>
    %46 = vector.shape_cast %45 : vector<1x32x32xf32> to vector<32x32xf32>
    %cst_42 = arith.constant dense<0.000000e+00> : vector<288x32xf32>
    %47 = tpu.matmul %44, %46, %cst_42 {dimension_numbers = #tpu.dot_dimension_numbers<[1], [0], [0], [1], [0, 0, 1, 1], [], []>} : vector<288x32xf32>, vector<32x32xf32>, vector<288x32xf32> -> vector<288x32xf32>
    %48 = arith.addf %42, %47 : vector<288x32xf32>
    %c0_43 = arith.constant 0 : index
    %c38 = arith.constant 38 : index
    %c0_44 = arith.constant 0 : index
    %49 = vector.load %arg1[%c0_43, %c38, %c0_44] : memref<1x342x32xf32, #tpu.memory_space<vmem>>, vector<1x288x32xf32>
    %50 = vector.shape_cast %49 : vector<1x288x32xf32> to vector<288x32xf32>
    %c8 = arith.constant 8 : index
    %c0_45 = arith.constant 0 : index
    %c0_46 = arith.constant 0 : index
    %51 = vector.load %arg2[%c8, %c0_45, %c0_46] : memref<9x32x32xf32, #tpu.memory_space<vmem>>, vector<1x32x32xf32>
    %52 = vector.shape_cast %51 : vector<1x32x32xf32> to vector<32x32xf32>
    %cst_47 = arith.constant dense<0.000000e+00> : vector<288x32xf32>
    %53 = tpu.matmul %50, %52, %cst_47 {dimension_numbers = #tpu.dot_dimension_numbers<[1], [0], [0], [1], [0, 0, 1, 1], [], []>} : vector<288x32xf32>, vector<32x32xf32>, vector<288x32xf32> -> vector<288x32xf32>
    %54 = arith.addf %48, %53 : vector<288x32xf32>
    %c0_48 = arith.constant 0 : index
    %c0_49 = arith.constant 0 : index
    %55 = vector.load %arg3[%c0_48, %c0_49] : memref<1x32xf32, #tpu.memory_space<vmem>>, vector<1x32xf32>
    %56 = vector.broadcast %55 : vector<1x32xf32> to vector<288x32xf32>
    %57 = arith.mulf %54, %56 : vector<288x32xf32>
    %c0_50 = arith.constant 0 : index
    %c0_51 = arith.constant 0 : index
    %58 = vector.load %arg4[%c0_50, %c0_51] : memref<1x32xf32, #tpu.memory_space<vmem>>, vector<1x32xf32>
    %59 = vector.broadcast %58 : vector<1x32xf32> to vector<288x32xf32>
    %60 = arith.addf %57, %59 : vector<288x32xf32>
    %c0_52 = arith.constant 0 : index
    %c0_53 = arith.constant 0 : index
    %c0_54 = arith.constant 0 : index
    %61 = vector.load %arg5[%c0_52, %c0_53, %c0_54] : memref<1x288x32xf32, #tpu.memory_space<vmem>>, vector<1x288x32xf32>
    %62 = vector.shape_cast %61 : vector<1x288x32xf32> to vector<288x32xf32>
    %63 = vector.shape_cast %60 : vector<288x32xf32> to vector<1x288x32xf32>
    tpu.vector_store %arg5[%c0_52, %c0_53, %c0_54], %63 {strides = array<i32>} : memref<1x288x32xf32, #tpu.memory_space<vmem>>, vector<1x288x32xf32>,
    return
  }
  func.func @transform_0(%arg0: i32) -> (i32, i32, i32) {
    %c0_i32 = arith.constant 0 : i32
    %c0_i32_0 = arith.constant 0 : i32
    %c0_i32_1 = arith.constant 0 : i32
    return %arg0, %c0_i32, %c0_i32_0 : i32, i32, i32
  }
  func.func @transform_1(%arg0: i32) -> (i32, i32, i32) {
    %c0_i32 = arith.constant 0 : i32
    %c0_i32_0 = arith.constant 0 : i32
    %c0_i32_1 = arith.constant 0 : i32
    %c0_i32_2 = arith.constant 0 : i32
    return %c0_i32, %c0_i32_0, %c0_i32_1 : i32, i32, i32
  }
  func.func @transform_2(%arg0: i32) -> (i32, i32) {
    %c0_i32 = arith.constant 0 : i32
    %c0_i32_0 = arith.constant 0 : i32
    %c0_i32_1 = arith.constant 0 : i32
    return %c0_i32, %c0_i32_0 : i32, i32
  }
  func.func @transform_3(%arg0: i32) -> (i32, i32) {
    %c0_i32 = arith.constant 0 : i32
    %c0_i32_0 = arith.constant 0 : i32
    %c0_i32_1 = arith.constant 0 : i32
    return %c0_i32, %c0_i32_0 : i32, i32
  }
  func.func @transform_4(%arg0: i32) -> (i32, i32, i32) {
    %c0_i32 = arith.constant 0 : i32
    %c0_i32_0 = arith.constant 0 : i32
    %c0_i32_1 = arith.constant 0 : i32
    return %arg0, %c0_i32, %c0_i32_0 : i32, i32, i32
  }
}

</mosaic_0001>

<bundles_post_ra>
// kernel: tpu_custom_call.1
= control target key start
LH: loop header
LB: loop body
LE: loop exit
PB: predicated region body
PF: predicated region fallthrough
CT: control target
= control target key end

     0   :  { %s5865_s15 = smov 0   ;;  %s7054_s0 = inlined_call_operand.vmem [shape: f32[2,342,32], index: 0, kind: input, shape index: {}]   ;;  %s7055_s1 = inlined_call_operand.vmem [shape: f32[9,32,32], index: 1, kind: input, shape index: {}]   ;;  %s7056_s2 = inlined_call_operand.vmem [shape: f32[1,32], index: 2, kind: input, shape index: {}]   ;;  %s7057_s3 = inlined_call_operand.vmem [shape: f32[1,32], index: 3, kind: input, shape index: {}]   ;;  %s7058_s4 = inlined_call_operand.vmem [shape: f32[2,288,32], index: 4, kind: output, shape index: {}]  }
   0x1 LB: > { %s4173_s16 = sadd.s32 4294967295, %s5838_s15   ;;  %p4177_p0 = scmp.ge.s32.totalorder %s5838_s15, 1  ;;  %s5838_s15 = sphi %s5865_s15, %s14_s15  }
   0x2   : > { %p162_p1 = scmp.lt.s32.totalorder %s5838_s15, 3 }
   0x4   : > { %p163_p2 = pnand %p4177_p0, %p162_p1 }
   0x5   : > { %v4180_v0 = vld [vmem:[%s7055_s1 + $0x20] sm:$0xff] (!%p163_p2)  ;;  %v4181_v1 = vld [vmem:[%s7055_s1 + $0x28] sm:$0xff] (!%p163_p2)  ;;  %p188_p3 = scmp.lt.s32.totalorder (!%p163_p2), %s4173_s16, 1  ;;  %v4182_v5 = vld [vmem:[%s7055_s1 + $0x30] sm:$0xff] (!%p163_p2)  ;;  %vm279_vm0 = vcmask (!%p163_p2), 261120  }
   0x6   : > { %166 = sbr.rel (%p163_p2) target bundleno = 559 (0x22f), region = 36  ;;  %v4336_v2 = vld [vmem:[%s7055_s1 + $0x80] sm:$0xff] (!%p163_p2)  ;;  %v5458_v3 = vpack.c.bf16 (!%p163_p2), %v4181_v1, %v4180_v0  ;;  %v4337_v4 = vld [vmem:[%s7055_s1 + $0x88] sm:$0xff] (!%p163_p2)  ;;  %v4183_v6 = vld [vmem:[%s7055_s1 + $0x38] sm:$0xff] (!%p163_p2) }
   0x7   : > { %v5891_v7 = vpack.c.bf16 (!%p163_p2), %v4337_v4, %v4336_v2  ;;  %v5462_v8 = vpack.c.bf16 (!%p163_p2), %v4183_v6, %v4182_v5  ;;  %v4338_v9 = vld [vmem:[%s7055_s1 + $0x90] sm:$0xff] (!%p163_p2)  ;;  %v4339_v10 = vld [vmem:[%s7055_s1 + $0x98] sm:$0xff] (!%p163_p2)  ;;  %v234_v11 = vld [vmem:[%s7055_s1] sm:$0xff] (!%p163_p2) }
   0x8   : > { %5459 = vmatprep.subr.bf16.mxu1 (!%p163_p2), %v5458_v3  ;;  %v5904_v12 = vpack.c.bf16 (!%p163_p2), %v4339_v10, %v4338_v9  ;;  %v235_v13 = vld [vmem:[%s7055_s1 + $0x8] sm:$0xff] (!%p163_p2)  ;;  %v4376_v14 = vld [vmem:[%s7055_s1 + $0xa0] sm:$0xff] (!%p163_p2)  ;;  %v4378_v18 = vld [vmem:[%s7055_s1 + $0xb0] sm:$0xff] (!%p163_p2) }
   0x9   : > { %v4377_v15 = vld [vmem:[%s7055_s1 + $0xa8] sm:$0xff] (!%p163_p2)  ;;  %5491 = vmatprep.subr.bf16.mxu0 (!%p163_p2), %v5891_v7  ;;  %5461 = vmatpush3.bf16.msra.mxu1 (!%p163_p2), %v5458_v3  ;;  %v5466_v16 = vpack.c.bf16 (!%p163_p2), %v235_v13, %v234_v11  ;;  %v4379_v21 = vld [vmem:[%s7055_s1 + $0xb8] sm:$0xff] (!%p163_p2)  ;;  %v236_v23 = vld [vmem:[%s7055_s1 + $0x10] sm:$0xff] (!%p163_p2) }
   0xa   : > { %5493 = vmatpush3.bf16.msra.mxu0 (!%p163_p2), %v5891_v7  ;;  %5463 = vmatprep.subr.bf16.mxu1 (!%p163_p2), %v5462_v8  ;;  %v5498_v17 = vpack.c.bf16 (!%p163_p2), %v4377_v15, %v4376_v14  ;;  %v237_v24 = vld [vmem:[%s7055_s1 + $0x18] sm:$0xff] (!%p163_p2)  ;;  %v5502_v27 = vpack.c.bf16 (!%p163_p2), %v4379_v21, %v4378_v18  ;;  %v4416_v30 = vld [vmem:[%s7055_s1 + $0xc0] sm:$0xff] (!%p163_p2)  ;;  %v4417_v31 = vld [vmem:[%s7055_s1 + $0xc8] sm:$0xff] (!%p163_p2) }
   0xb   : > { %5495 = vmatprep.subr.bf16.mxu0 (!%p163_p2), %v5904_v12  ;;  %v5470_v29 = vpack.c.bf16 (!%p163_p2), %v237_v24, %v236_v23  ;;  %v4256_v33 = vld [vmem:[%s7055_s1 + $0x40] sm:$0xff] (!%p163_p2)  ;;  %v4257_v34 = vld [vmem:[%s7055_s1 + $0x48] sm:$0xff] (!%p163_p2)  ;;  %v5965_v38 = vpack.c.bf16 (!%p163_p2), %v4417_v31, %v4416_v30  ;;  %v4418_v4 = vld [vmem:[%s7055_s1 + $0xd0] sm:$0xff] (!%p163_p2) }
   0xc   : > { %v5968_v39 = vpack.c.bf16 (!%p163_p2), %v4257_v34, %v4256_v33  ;;  %v4419_v5 = vld [vmem:[%s7055_s1 + $0xd8] sm:$0xff] (!%p163_p2)  ;;  %v4456_v13 = vld [vmem:[%s7055_s1 + $0xe0] sm:$0xff] (!%p163_p2)  ;;  %v4457_v14 = vld [vmem:[%s7055_s1 + $0xe8] sm:$0xff] (!%p163_p2) }
   0xd   : > { %s7060_s16 = smov (!%p188_p3, %s4173_s16), 1  ;;  %5465 = vmatpush3.bf16.msra.mxu1 %v5462_v8  ;;  %v5510_v11 = vpack.c.bf16 %v4419_v5, %v4418_v4 }
   0xe   : > { %s5822_s17 = smul.u32 344, %s7060_s16  ;;  %5497 = vmatpush3.bf16.msra.mxu0 %v5904_v12  ;;  %5467 = vmatprep.subr.bf16.mxu1 %v5466_v16 }
   0xf   : > { %5499 = vmatprep.subr.bf16.mxu0 %v5498_v17 }
  0x10   : > { %s5922_s20 = scalar_lea.vmem %s7054_s0, %s5822_s17 }
  0x11   : > { %v238_v19 = vld [vmem:[%s5922_s20 + $0x1] sm:$0xff]  ;;  %v1846_v20 = vld [vmem:[%s5922_s20 + $0x13] sm:$0xff]  ;;  %v239_v22 = vld [vmem:[%s5922_s20 + $0x9] sm:$0xff] }
  0x12   : > { %4908 = vmatprep.mubr.msk.f32.mxu1 %vm279_vm0, %v238_v19  ;;  %5156 = vmatprep.mubr.msk.f32.mxu0 %vm279_vm0, %v1846_v20  ;;  %v1847_v25 = vld [vmem:[%s5922_s20 + $0x1b] sm:$0xff]  ;;  %v240_v26 = vld [vmem:[%s5922_s20 + $0x11] sm:$0xff]  ;;  %v1848_v28 = vld [vmem:[%s5922_s20 + $0x23] sm:$0xff]  ;;  %v6063_v19 = vpack.c.bf16 %v4457_v14, %v4456_v13 }
  0x13   : > { %4909 = vmatmul.mubr.msk.f32.vlgmr.msra.gmra.mrb[0].mxu1 %vm279_vm0, %v239_v22  ;;  %5157 = vmatmul.mubr.msk.f32.vlgmr.msra.gmra.mrb[0].mxu0 %vm279_vm0, %v1847_v25  ;;  %v241_v32 = vld [vmem:[%s5922_s20 + $0x19] sm:$0xff]  ;;  %v1849_v35 = vld [vmem:[%s5922_s20 + $0x2b] sm:$0xff]  ;;  %v242_v36 = vld [vmem:[%s5922_s20 + $0x21] sm:$0xff] }
  0x14   : > { %5469 = vmatpush3.bf16.msra.mxu1 %v5466_v16  ;;  %5501 = vmatpush3.bf16.msra.mxu0 %v5498_v17  ;;  %v1850_v37 = vld [vmem:[%s5922_s20 + $0x33] sm:$0xff]  ;;  %v243_v40 = vld [vmem:[%s5922_s20 + $0x29] sm:$0xff]  ;;  %v1851_v41 = vld [vmem:[%s5922_s20 + $0x3b] sm:$0xff] }
  0x15   : > { %4911 = vmatprep.mubr.msk.f32.mxu1 %vm279_vm0, %v240_v26  ;;  %5159 = vmatprep.mubr.msk.f32.mxu0 %vm279_vm0, %v1848_v28  ;;  %v244_v42 = vld [vmem:[%s5922_s20 + $0x31] sm:$0xff]  ;;  %v1852_v43 = vld [vmem:[%s5922_s20 + $0x43] sm:$0xff]  ;;  %v245_v44 = vld [vmem:[%s5922_s20 + $0x39] sm:$0xff] }
  0x16   : > { %5503 = vmatprep.subr.bf16.mxu0 %v5502_v27  ;;  %5471 = vmatprep.subr.bf16.mxu1 %v5470_v29  ;;  %v1853_v45 = vld [vmem:[%s5922_s20 + $0x4b] sm:$0xff]  ;;  %v246_v46 = vld [vmem:[%s5922_s20 + $0x41] sm:$0xff]  ;;  %v1854_v47 = vld [vmem:[%s5922_s20 + $0x53] sm:$0xff] }
  0x17   : > { %4912 = vmatmul.mubr.msk.f32.gmra.mrb[2].mxu1 %vm279_vm0, %v241_v32  ;;  %5160 = vmatmul.mubr.msk.f32.gmra.mrb[2].mxu0 %vm279_vm0, %v1849_v35  ;;  %v247_v48 = vld [vmem:[%s5922_s20 + $0x49] sm:$0xff]  ;;  %v1855_v49 = vld [vmem:[%s5922_s20 + $0x5b] sm:$0xff]  ;;  %v248_v50 = vld [vmem:[%s5922_s20 + $0x51] sm:$0xff] }
  0x18   : > { %4914 = vmatprep.mubr.msk.f32.mxu1 %vm279_vm0, %v242_v36  ;;  %5162 = vmatprep.mubr.msk.f32.mxu0 %vm279_vm0, %v1850_v37  ;;  %v1856_v51 = vld [vmem:[%s5922_s20 + $0x63] sm:$0xff]  ;;  %v249_v52 = vld [vmem:[%s5922_s20 + $0x59] sm:$0xff]  ;;  %v1857_v53 = vld [vmem:[%s5922_s20 + $0x6b] sm:$0xff] }
  0x19   : > { %5505 = vmatpush3.bf16.msra.mxu0 %v5502_v27  ;;  %5473 = vmatpush3.bf16.msra.mxu1 %v5470_v29  ;;  %v250_v54 = vld [vmem:[%s5922_s20 + $0x61] sm:$0xff]  ;;  %v1858_v55 = vld [vmem:[%s5922_s20 + $0x73] sm:$0xff]  ;;  %v251_v56 = vld [vmem:[%s5922_s20 + $0x69] sm:$0xff] }
  0x1a   : > { %5507 = vmatprep.subr.bf16.mxu0 %v5965_v38  ;;  %5475 = vmatprep.subr.bf16.mxu1 %v5968_v39  ;;  %v1859_v57 = vld [vmem:[%s5922_s20 + $0x7b] sm:$0xff]  ;;  %v252_v58 = vld [vmem:[%s5922_s20 + $0x71] sm:$0xff]  ;;  %v1860_v59 = vld [vmem:[%s5922_s20 + $0x83] sm:$0xff] }
  0x1b   : > { %4915 = vmatmul.mubr.msk.f32.gmra.mrb[4].mxu1 %vm279_vm0, %v243_v40  ;;  %5163 = vmatmul.mubr.msk.f32.gmra.mrb[4].mxu0 %vm279_vm0, %v1851_v41  ;;  %v253_v60 = vld [vmem:[%s5922_s20 + $0x79] sm:$0xff]  ;;  %v1861_v61 = vld [vmem:[%s5922_s20 + $0x8b] sm:$0xff]  ;;  %v254_v62 = vld [vmem:[%s5922_s20 + $0x81] sm:$0xff] }
  0x1c   : > { %4917 = vmatprep.mubr.msk.f32.mxu1 %vm279_vm0, %v244_v42  ;;  %5165 = vmatprep.mubr.msk.f32.mxu0 %vm279_vm0, %v1852_v43  ;;  %v1862_v63 = vld [vmem:[%s5922_s20 + $0x93] sm:$0xff]  ;;  %v255_v0 = vld [vmem:[%s5922_s20 + $0x89] sm:$0xff]  ;;  %v1863_v1 = vld [vmem:[%s5922_s20 + $0x9b] sm:$0xff] }
  0x1d   : > { %v256_v2 = vld [vmem:[%s5922_s20 + $0x91] sm:$0xff]  ;;  %v257_v6 = vld [vmem:[%s5922_s20 + $0x99] sm:$0xff]  ;;  %v258_v9 = vld [vmem:[%s5922_s20 + $0xa1] sm:$0xff] }
  0x1e   : > { %v2276_v3 = vld [vmem:[%s5922_s20 + $0x14] sm:$0xff]  ;;  %v2277_v8 = vld [vmem:[%s5922_s20 + $0x1c] sm:$0xff]  ;;  %v6041_v10 = vld [vmem:[%s5922_s20 + $0x24] sm:$0xff] }
  0x1f   : > { %4918 = vmatmul.mubr.msk.f32.gmra.mrb[6].mxu1 %vm279_vm0, %v245_v44  ;;  %5166 = vmatmul.mubr.msk.f32.gmra.mrb[6].mxu0 %vm279_vm0, %v1853_v45  ;;  %v259_v15 = vld [vmem:[%s5922_s20 + $0xa9] sm:$0xff]  ;;  %v260_v17 = vld [vmem:[%s5922_s20 + $0xb1] sm:$0xff]  ;;  %v261_v20 = vld [vmem:[%s5922_s20 + $0xb9] sm:$0xff] }
  0x20   : > { %4920 = vmatprep.mubr.msk.f32.mxu1 %vm279_vm0, %v246_v46  ;;  %5168 = vmatprep.mubr.msk.f32.mxu0 %vm279_vm0, %v1854_v47  ;;  %v6057_v16 = vld [vmem:[%s5922_s20 + $0x2c] sm:$0xff]  ;;  %v6061_v18 = vld [vmem:[%s5922_s20 + $0x34] sm:$0xff]  ;;  %v6073_v21 = vld [vmem:[%s5922_s20 + $0x3c] sm:$0xff] }
  0x21   : > { %v262_v22 = vld [vmem:[%s5922_s20 + $0xc1] sm:$0xff]  ;;  %v263_v24 = vld [vmem:[%s5922_s20 + $0xc9] sm:$0xff]  ;;  %v264_v26 = vld [vmem:[%s5922_s20 + $0xd1] sm:$0xff] }
  0x22   : > { %v6077_v23 = vld [vmem:[%s5922_s20 + $0x44] sm:$0xff]  ;;  %v6088_v25 = vld [vmem:[%s5922_s20 + $0x4c] sm:$0xff]  ;;  %v6092_v27 = vld [vmem:[%s5922_s20 + $0x54] sm:$0xff] }
  0x23   : > { %4921 = vmatmul.mubr.msk.f32.gmra.mrb[8].mxu1 %vm279_vm0, %v247_v48  ;;  %5169 = vmatmul.mubr.msk.f32.gmra.mrb[8].mxu0 %vm279_vm0, %v1855_v49  ;;  %v265_v28 = vld [vmem:[%s5922_s20 + $0xd9] sm:$0xff]  ;;  %v266_v30 = vld [vmem:[%s5922_s20 + $0xe1] sm:$0xff]  ;;  %v267_v32 = vld [vmem:[%s5922_s20 + $0xe9] sm:$0xff] }
  0x24   : > { %4923 = vmatprep.mubr.msk.f32.mxu1 %vm279_vm0, %v248_v50  ;;  %5171 = vmatprep.mubr.msk.f32.mxu0 %vm279_vm0, %v1856_v51  ;;  %v6102_v29 = vld [vmem:[%s5922_s20 + $0x5c] sm:$0xff]  ;;  %v6106_v31 = vld [vmem:[%s5922_s20 + $0x64] sm:$0xff]  ;;  %v6116_v33 = vld [vmem:[%s5922_s20 + $0x6c] sm:$0xff] }
  0x25   : > { %v268_v34 = vld [vmem:[%s5922_s20 + $0xf1] sm:$0xff]  ;;  %v269_v36 = vld [vmem:[%s5922_s20 + $0xf9] sm:$0xff]  ;;  %v6134_v40 = vld [vmem:[%s5922_s20 + $0x84] sm:$0xff] }
  0x26   : > { %v6120_v35 = vld [vmem:[%s5922_s20 + $0x74] sm:$0xff]  ;;  %v6130_v37 = vld [vmem:[%s5922_s20 + $0x7c] sm:$0xff]  ;;  %v271_v41 = vld [vmem:[%s5922_s20 + $0x109] sm:$0xff] }
  0x27   : > { %4924 = vmatmul.mubr.msk.f32.gmra.mrb[10].mxu1 %vm279_vm0, %v249_v52  ;;  %5172 = vmatmul.mubr.msk.f32.gmra.mrb[10].mxu0 %vm279_vm0, %v1857_v53  ;;  %v6144_v42 = vld [vmem:[%s5922_s20 + $0x8c] sm:$0xff]  ;;  %v6148_v44 = vld [vmem:[%s5922_s20 + $0x94] sm:$0xff]  ;;  %v6158_v46 = vld [vmem:[%s5922_s20 + $0x9c] sm:$0xff] }
  0x28   : > { %4926 = vmatprep.mubr.msk.f32.mxu1 %vm279_vm0, %v250_v54  ;;  %5174 = vmatprep.mubr.msk.f32.mxu0 %vm279_vm0, %v1858_v55  ;;  %v272_v43 = vld [vmem:[%s5922_s20 + $0x111] sm:$0xff]  ;;  %v273_v45 = vld [vmem:[%s5922_s20 + $0x119] sm:$0xff]  ;;  %v6162_v48 = vld [vmem:[%s5922_s20 + $0xa4] sm:$0xff] }
  0x29   : > { %v198_v47 = vld [vmem:[%s5922_s20] sm:$0xff]  ;;  %v4258_v49 = vld [vmem:[%s7055_s1 + $0x50] sm:$0xff]  ;;  %v4259_v50 = vld [vmem:[%s7055_s1 + $0x58] sm:$0xff] }
  0x2a   : > { %v199_v51 = vld [vmem:[%s5922_s20 + $0x8] sm:$0xff]  ;;  %v200_v53 = vld [vmem:[%s5922_s20 + $0x10] sm:$0xff]  ;;  %v5478_v55 = vpack.c.bf16 %v4259_v50, %v4258_v49  ;;  %v206_v4 = vld [vmem:[%s5922_s20 + $0x40] sm:$0xff] }
  0x2b   : > { %4927 = vmatmul.mubr.msk.f32.gmra.mrb[12].mxu1 %vm279_vm0, %v251_v56  ;;  %5175 = vmatmul.mubr.msk.f32.gmra.mrb[12].mxu0 %vm279_vm0, %v1859_v57  ;;  %v6178_v52 = vld [vmem:[%s5922_s20 + $0xac] sm:$0xff]  ;;  %v6182_v54 = vld [vmem:[%s5922_s20 + $0xb4] sm:$0xff]  ;;  %v4296_v56 = vld [vmem:[%s7055_s1 + $0x60] sm:$0xff] }
  0x2c   : > { %4929 = vmatprep.mubr.msk.f32.mxu1 %vm279_vm0, %v252_v58  ;;  %5177 = vmatprep.mubr.msk.f32.mxu0 %vm279_vm0, %v1860_v59  ;;  %v4297_v57 = vld [vmem:[%s7055_s1 + $0x68] sm:$0xff]  ;;  %v201_v58 = vld [vmem:[%s5922_s20 + $0x18] sm:$0xff]  ;;  %v218_v49 = vld [vmem:[%s5922_s20 + $0xa0] sm:$0xff] }
  0x2d   : > { %v6199_v59 = vld [vmem:[%s5922_s20 + $0xbc] sm:$0xff]  ;;  %v6234_v5 = vld [vmem:[%s5922_s20 + $0xe4] sm:$0xff] }
  0x2e   : > { %v209_v13 = vld [vmem:[%s5922_s20 + $0x58] sm:$0xff] }
  0x2f   : > { %4930 = vmatmul.mubr.msk.f32.gmra.mrb[14].mxu1 %vm279_vm0, %v253_v60  ;;  %5178 = vmatmul.mubr.msk.f32.gmra.mrb[14].mxu0 %vm279_vm0, %v1861_v61  ;;  %v202_v60 = vld [vmem:[%s5922_s20 + $0x20] sm:$0xff] }
  0x30   : > { %4932 = vmatprep.mubr.msk.f32.mxu1 %vm279_vm0, %v254_v62  ;;  %5180 = vmatprep.mubr.msk.f32.mxu0 %vm279_vm0, %v1862_v63  ;;  %v6203_v61 = vld [vmem:[%s5922_s20 + $0xc4] sm:$0xff]  ;;  %v6205_v62 = vpack.c.bf16 %v4297_v57, %v4296_v56  ;;  %v6215_v63 = vld [vmem:[%s5922_s20 + $0xcc] sm:$0xff]  ;;  %v6258_v14 = vld [vmem:[%s5922_s20 + $0xfc] sm:$0xff] }
  0x31   : > { %v4299_v57 = vld [vmem:[%s7055_s1 + $0x78] sm:$0xff] }
  0x33   : > { %4933 = vmatmul.mubr.msk.f32.gmra.mrb[16].mxu1 %vm279_vm0, %v255_v0  ;;  %5181 = vmatmul.mubr.msk.f32.gmra.mrb[16].mxu0 %vm279_vm0, %v1863_v1  ;;  %v204_v0 = vld [vmem:[%s5922_s20 + $0x30] sm:$0xff] }
  0x34   : > { %4935 = vmatprep.mubr.msk.f32.mxu1 %vm279_vm0, %v256_v2  ;;  %5218 = vmatprep.mubr.msk.f32.mxu0 %vm279_vm0, %v2276_v3  ;;  %v6219_v1 = vld [vmem:[%s5922_s20 + $0xd4] sm:$0xff]  ;;  %v6230_v3 = vld [vmem:[%s5922_s20 + $0xdc] sm:$0xff] }
  0x35   : > { %v205_v2 = vld [vmem:[%s5922_s20 + $0x38] sm:$0xff] }
  0x37   : > { %4936 = vmatmul.mubr.msk.f32.gmra.mrb[18].mxu1 %vm279_vm0, %v257_v6  ;;  %5219 = vmatmul.mubr.msk.f32.vlgmr.msra.gmra.mrb[0].mxu0 %vm279_vm0, %v2277_v8  ;;  %v207_v6 = vld [vmem:[%s5922_s20 + $0x48] sm:$0xff] }
  0x38   : > { %4938 = vmatprep.mubr.msk.f32.mxu1 %vm279_vm0, %v258_v9  ;;  %5509 = vmatpush3.bf16.msra.mxu0 %v5965_v38  ;;  %v270_v38 = vld [vmem:[%s5922_s20 + $0x101] sm:$0xff]  ;;  %v6244_v8 = vld [vmem:[%s5922_s20 + $0xec] sm:$0xff] }
  0x39   : > { %5221 = vmatprep.mubr.msk.f32.mxu0 %vm279_vm0, %v6041_v10  ;;  %5511 = vmatprep.subr.bf16.mxu0 %v5510_v11  ;;  %v208_v9 = vld [vmem:[%s5922_s20 + $0x50] sm:$0xff] }
  0x3b   : > { %4939 = vmatmul.mubr.msk.f32.gmra.mrb[20].mxu1 %vm279_vm0, %v259_v15  ;;  %5222 = vmatmul.mubr.msk.f32.gmra.mrb[2].mxu0 %vm279_vm0, %v6057_v16  ;;  %v210_v15 = vld [vmem:[%s5922_s20 + $0x60] sm:$0xff] }
  0x3c   : > { %4941 = vmatprep.mubr.msk.f32.mxu1 %vm279_vm0, %v260_v17  ;;  %5224 = vmatprep.mubr.msk.f32.mxu0 %vm279_vm0, %v6061_v18  ;;  %v6262_v17 = vld [vmem:[%s5922_s20 + $0x104] sm:$0xff] }
  0x3d   : > { %5513 = vmatpush3.bf16.msra.mxu0 %v5510_v11  ;;  %v6248_v11 = vld [vmem:[%s5922_s20 + $0xf4] sm:$0xff] }
  0x3e   : > { %5515 = vmatprep.subr.bf16.mxu0 %v6063_v19 }
  0x3f   : > { %4942 = vmatmul.mubr.msk.f32.gmra.mrb[22].mxu1 %vm279_vm0, %v261_v20  ;;  %5225 = vmatmul.mubr.msk.f32.gmra.mrb[4].mxu0 %vm279_vm0, %v6073_v21  ;;  %v211_v20 = vld [vmem:[%s5922_s20 + $0x68] sm:$0xff] }
  0x40   : > { %4944 = vmatprep.mubr.msk.f32.mxu1 %vm279_vm0, %v262_v22  ;;  %5227 = vmatprep.mubr.msk.f32.mxu0 %vm279_vm0, %v6077_v23  ;;  %v6272_v22 = vld [vmem:[%s5922_s20 + $0x10c] sm:$0xff] }
  0x43   : > { %4945 = vmatmul.mubr.msk.f32.gmra.mrb[24].mxu1 %vm279_vm0, %v263_v24  ;;  %5228 = vmatmul.mubr.msk.f32.gmra.mrb[6].mxu0 %vm279_vm0, %v6088_v25  ;;  %v212_v24 = vld [vmem:[%s5922_s20 + $0x70] sm:$0xff] }
  0x44   : > { %4947 = vmatprep.mubr.msk.f32.mxu1 %vm279_vm0, %v264_v26  ;;  %5230 = vmatprep.mubr.msk.f32.mxu0 %vm279_vm0, %v6092_v27  ;;  %v6276_v26 = vld [vmem:[%s5922_s20 + $0x114] sm:$0xff] }
  0x47   : > { %4948 = vmatmul.mubr.msk.f32.gmra.mrb[26].mxu1 %vm279_vm0, %v265_v28  ;;  %5231 = vmatmul.mubr.msk.f32.gmra.mrb[8].mxu0 %vm279_vm0, %v6102_v29  ;;  %v213_v28 = vld [vmem:[%s5922_s20 + $0x78] sm:$0xff] }
  0x48   : > { %4950 = vmatprep.mubr.msk.f32.mxu1 %vm279_vm0, %v266_v30  ;;  %5233 = vmatprep.mubr.msk.f32.mxu0 %vm279_vm0, %v6106_v31  ;;  %v6286_v30 = vld [vmem:[%s5922_s20 + $0x11c] sm:$0xff] }
  0x4b   : > { %4951 = vmatmul.mubr.msk.f32.gmra.mrb[28].mxu1 %vm279_vm0, %v267_v32  ;;  %5234 = vmatmul.mubr.msk.f32.gmra.mrb[10].mxu0 %vm279_vm0, %v6116_v33  ;;  %v214_v32 = vld [vmem:[%s5922_s20 + $0x80] sm:$0xff] }
  0x4c   : > { %4953 = vmatprep.mubr.msk.f32.mxu1 %vm279_vm0, %v268_v34  ;;  %5236 = vmatprep.mubr.msk.f32.mxu0 %vm279_vm0, %v6120_v35  ;;  %v6290_v34 = vld [vmem:[%s5922_s20 + $0x124] sm:$0xff] }
  0x4f   : > { %4954 = vmatmul.mubr.msk.f32.gmra.mrb[30].mxu1 %vm279_vm0, %v269_v36  ;;  %5237 = vmatmul.mubr.msk.f32.gmra.mrb[12].mxu0 %vm279_vm0, %v6130_v37  ;;  %v215_v36 = vld [vmem:[%s5922_s20 + $0x88] sm:$0xff] }
  0x50   : > { %4956 = vmatprep.mubr.msk.f32.mxu1 %vm279_vm0, %v270_v38  ;;  %5239 = vmatprep.mubr.msk.f32.mxu0 %vm279_vm0, %v6134_v40  ;;  %v6300_v38 = vld [vmem:[%s5922_s20 + $0x12c] sm:$0xff] }
  0x53   : > { %4957 = vmatmul.mubr.msk.f32.gmra.mrb[32].mxu1 %vm279_vm0, %v271_v41  ;;  %5240 = vmatmul.mubr.msk.f32.gmra.mrb[14].mxu0 %vm279_vm0, %v6144_v42  ;;  %v216_v41 = vld [vmem:[%s5922_s20 + $0x90] sm:$0xff] }
  0x54   : > { %4959 = vmatprep.mubr.msk.f32.mxu1 %vm279_vm0, %v272_v43  ;;  %5242 = vmatprep.mubr.msk.f32.mxu0 %vm279_vm0, %v6148_v44  ;;  %v4458_v43 = vld [vmem:[%s7055_s1 + $0xf0] sm:$0xff] }
  0x57   : > { %4960 = vmatmul.mubr.msk.f32.gmra.mrb[34].mxu1 %vm279_vm0, %v273_v45  ;;  %5243 = vmatmul.mubr.msk.f32.gmra.mrb[16].mxu0 %vm279_vm0, %v6158_v46  ;;  %v4459_v45 = vld [vmem:[%s7055_s1 + $0xf8] sm:$0xff] }
  0x58   : > { %4970 = vmatprep.mubr.msk.f32.mxu1 %vm279_vm0, %v198_v47  ;;  %5245 = vmatprep.mubr.msk.f32.mxu0 %vm279_vm0, %v6162_v48  ;;  %v217_v47 = vld [vmem:[%s5922_s20 + $0x98] sm:$0xff]  ;;  %v5518_v50 = vpack.c.bf16 %v4459_v45, %v4458_v43  ;;  %v6577_v45 = vld [vmem:[%s5922_s20 + $0xca] sm:$0xff] }
  0x59   : > { %v3142_v43 = vld [vmem:[%s5922_s20 + $0x55] sm:$0xff] }
  0x5b   : > { %4971 = vmatmul.mubr.msk.f32.vlgmr.msra.gmra.mrb[0].mxu1 %vm279_vm0, %v199_v51  ;;  %5246 = vmatmul.mubr.msk.f32.gmra.mrb[18].mxu0 %vm279_vm0, %v6178_v52  ;;  %v4496_v51 = vld [vmem:[%s7055_s1 + $0x100] sm:$0xff] }
  0x5c   : > { %5477 = vmatpush3.bf16.msra.mxu1 %v5968_v39  ;;  %4973 = vmatprep.mubr.msk.f32.mxu1 %vm279_vm0, %v200_v53  ;;  %v203_v39 = vld [vmem:[%s5922_s20 + $0x28] sm:$0xff] }
  0x5d   : > { %5248 = vmatprep.mubr.msk.f32.mxu0 %vm279_vm0, %v6182_v54  ;;  %5479 = vmatprep.subr.bf16.mxu1 %v5478_v55  ;;  %v4497_v53 = vld [vmem:[%s7055_s1 + $0x108] sm:$0xff] }
  0x5e   : > { %v6332_v56 = vpack.c.bf16 %v4497_v53, %v4496_v51  ;;  %v6591_v51 = vld [vmem:[%s5922_s20 + $0xda] sm:$0xff]  ;;  %v3145_v53 = vld [vmem:[%s5922_s20 + $0x6d] sm:$0xff] }
  0x5f   : > { %4974 = vmatmul.mubr.msk.f32.gmra.mrb[2].mxu1 %vm279_vm0, %v201_v58  ;;  %5249 = vmatmul.mubr.msk.f32.gmra.mrb[20].mxu0 %vm279_vm0, %v6199_v59 }
  0x60   : > { %4976 = vmatprep.mubr.msk.f32.mxu1 %vm279_vm0, %v202_v60  ;;  %5251 = vmatprep.mubr.msk.f32.mxu0 %vm279_vm0, %v6203_v61  ;;  %v6412_v60 = vld [vmem:[%s5922_s20 + $0x1a] sm:$0xff] }
  0x61   : > { %5481 = vmatpush3.bf16.msra.mxu1 %v5478_v55  ;;  %v220_v55 = vld [vmem:[%s5922_s20 + $0xb0] sm:$0xff] }
  0x62   : > { %5483 = vmatprep.subr.bf16.mxu1 %v6205_v62 }
  0x63   : > { %4977 = vmatmul.mubr.msk.f32.gmra.mrb[4].mxu1 %vm279_vm0, %v203_v39  ;;  %5252 = vmatmul.mubr.msk.f32.gmra.mrb[22].mxu0 %vm279_vm0, %v6215_v63  ;;  %v6457_v39 = vld [vmem:[%s5922_s20 + $0x4a] sm:$0xff] }
  0x64   : > { %4979 = vmatprep.mubr.msk.f32.mxu1 %vm279_vm0, %v204_v0  ;;  %5254 = vmatprep.mubr.msk.f32.mxu0 %vm279_vm0, %v6219_v1  ;;  %v6471_v0 = vld [vmem:[%s5922_s20 + $0x5a] sm:$0xff] }
  0x67   : > { %4980 = vmatmul.mubr.msk.f32.gmra.mrb[6].mxu1 %vm279_vm0, %v205_v2  ;;  %5255 = vmatmul.mubr.msk.f32.gmra.mrb[24].mxu0 %vm279_vm0, %v6230_v3  ;;  %v6485_v2 = vld [vmem:[%s5922_s20 + $0x6a] sm:$0xff] }
  0x68   : > { %4982 = vmatprep.mubr.msk.f32.mxu1 %vm279_vm0, %v206_v4  ;;  %5257 = vmatprep.mubr.msk.f32.mxu0 %vm279_vm0, %v6234_v5  ;;  %v6499_v4 = vld [vmem:[%s5922_s20 + $0x7a] sm:$0xff] }
  0x6b   : > { %4983 = vmatmul.mubr.msk.f32.gmra.mrb[8].mxu1 %vm279_vm0, %v207_v6  ;;  %5258 = vmatmul.mubr.msk.f32.gmra.mrb[26].mxu0 %vm279_vm0, %v6244_v8  ;;  %v2740_v6 = vld [vmem:[%s5922_s20 + $0x134] sm:$0xff] }
  0x6c   : > { %4985 = vmatprep.mubr.msk.f32.mxu1 %vm279_vm0, %v208_v9  ;;  %5260 = vmatprep.mubr.msk.f32.mxu0 %vm279_vm0, %v6248_v11  ;;  %v2741_v9 = vld [vmem:[%s5922_s20 + $0x13c] sm:$0xff] }
  0x6f   : > { %4986 = vmatmul.mubr.msk.f32.gmra.mrb[10].mxu1 %vm279_vm0, %v209_v13  ;;  %5261 = vmatmul.mubr.msk.f32.gmra.mrb[28].mxu0 %vm279_vm0, %v6258_v14  ;;  %v3136_v13 = vld [vmem:[%s5922_s20 + $0x25] sm:$0xff] }
  0x70   : > { %4988 = vmatprep.mubr.msk.f32.mxu1 %vm279_vm0, %v210_v15  ;;  %5263 = vmatprep.mubr.msk.f32.mxu0 %vm279_vm0, %v6262_v17  ;;  %v4499_v15 = vld [vmem:[%s7055_s1 + $0x118] sm:$0xff] }
  0x73   : > { %4989 = vmatmul.mubr.msk.f32.gmra.mrb[12].mxu1 %vm279_vm0, %v211_v20  ;;  %5264 = vmatmul.mubr.msk.f32.gmra.mrb[30].mxu0 %vm279_vm0, %v6272_v22  ;;  %v3137_v20 = vld [vmem:[%s5922_s20 + $0x2d] sm:$0xff] }
  0x74   : > { %4991 = vmatprep.mubr.msk.f32.mxu1 %vm279_vm0, %v212_v24  ;;  %5266 = vmatprep.mubr.msk.f32.mxu0 %vm279_vm0, %v6276_v26  ;;  %v3138_v24 = vld [vmem:[%s5922_s20 + $0x35] sm:$0xff] }
  0x77   : > { %4992 = vmatmul.mubr.msk.f32.gmra.mrb[14].mxu1 %vm279_vm0, %v213_v28  ;;  %5267 = vmatmul.mubr.msk.f32.gmra.mrb[32].mxu0 %vm279_vm0, %v6286_v30  ;;  %v6548_v28 = vld [vmem:[%s5922_s20 + $0xaa] sm:$0xff] }
  0x78   : > { %4994 = vmatprep.mubr.msk.f32.mxu1 %vm279_vm0, %v214_v32  ;;  %5269 = vmatprep.mubr.msk.f32.mxu0 %vm279_vm0, %v6290_v34  ;;  %v6554_v32 = vld [vmem:[%s5922_s20 + $0xb2] sm:$0xff] }
  0x7b   : > { %4995 = vmatmul.mubr.msk.f32.gmra.mrb[16].mxu1 %vm279_vm0, %v215_v36  ;;  %5270 = vmatmul.mubr.msk.f32.gmra.mrb[34].mxu0 %vm279_vm0, %v6300_v38  ;;  %v6563_v36 = vld [vmem:[%s5922_s20 + $0xba] sm:$0xff] }
  0x7c   : > { %4997 = vmatprep.mubr.msk.f32.mxu1 %vm279_vm0, %v216_v41  ;;  %5280 = vmatprep.mubr.msk.f32.mxu0 %vm279_vm0, %v6041_v10  ;;  %v219_v10 = vld [vmem:[%s5922_s20 + $0xa8] sm:$0xff] }
  0x7d   : > { %v6568_v41 = vld [vmem:[%s5922_s20 + $0xc2] sm:$0xff] }
  0x7f   : > { %4998 = vmatmul.mubr.msk.f32.gmra.mrb[18].mxu1 %vm279_vm0, %v217_v47  ;;  %5281 = vmatmul.mubr.msk.f32.vlgmr.msra.gmra.mrb[0].mxu0 %vm279_vm0, %v6057_v16  ;;  %v221_v16 = vld [vmem:[%s5922_s20 + $0xb8] sm:$0xff] }
  0x80   : > { %5000 = vmatprep.mubr.msk.f32.mxu1 %vm279_vm0, %v218_v49  ;;  %5517 = vmatpush3.bf16.msra.mxu0 %v6063_v19  ;;  %v222_v19 = vld [vmem:[%s5922_s20 + $0xc0] sm:$0xff]  ;;  %v6582_v49 = vld [vmem:[%s5922_s20 + $0xd2] sm:$0xff] }
  0x81   : > { %5283 = vmatprep.mubr.msk.f32.mxu0 %vm279_vm0, %v6061_v18  ;;  %5519 = vmatprep.subr.bf16.mxu0 %v5518_v50  ;;  %v223_v18 = vld [vmem:[%s5922_s20 + $0xc8] sm:$0xff]  ;;  %v3143_v47 = vld [vmem:[%s5922_s20 + $0x5d] sm:$0xff] }
  0x83   : > { %5001 = vmatmul.mubr.msk.f32.gmra.mrb[20].mxu1 %vm279_vm0, %v219_v10  ;;  %5284 = vmatmul.mubr.msk.f32.gmra.mrb[2].mxu0 %vm279_vm0, %v6073_v21  ;;  %v224_v21 = vld [vmem:[%s5922_s20 + $0xd0] sm:$0xff]  ;;  %v6596_v10 = vld [vmem:[%s5922_s20 + $0xe2] sm:$0xff] }
  0x84   : > { %5003 = vmatprep.mubr.msk.f32.mxu1 %vm279_vm0, %v220_v55  ;;  %5286 = vmatprep.mubr.msk.f32.mxu0 %vm279_vm0, %v6077_v23  ;;  %v225_v23 = vld [vmem:[%s5922_s20 + $0xd8] sm:$0xff] }
  0x85   : > { %5521 = vmatpush3.bf16.msra.mxu0 %v5518_v50  ;;  %v3144_v50 = vld [vmem:[%s5922_s20 + $0x65] sm:$0xff]  ;;  %v3146_v55 = vld [vmem:[%s5922_s20 + $0x75] sm:$0xff] }
  0x86   : > { %5523 = vmatprep.subr.bf16.mxu0 %v6332_v56 }
  0x87   : > { %5004 = vmatmul.mubr.msk.f32.gmra.mrb[22].mxu1 %vm279_vm0, %v221_v16  ;;  %5287 = vmatmul.mubr.msk.f32.gmra.mrb[4].mxu0 %vm279_vm0, %v6088_v25  ;;  %v226_v25 = vld [vmem:[%s5922_s20 + $0xe0] sm:$0xff] }
  0x88   : > { %5006 = vmatprep.mubr.msk.f32.mxu1 %vm279_vm0, %v222_v19  ;;  %5289 = vmatprep.mubr.msk.f32.mxu0 %vm279_vm0, %v6092_v27  ;;  %v227_v27 = vld [vmem:[%s5922_s20 + $0xe8] sm:$0xff]  ;;  %v3147_v16 = vld [vmem:[%s5922_s20 + $0x7d] sm:$0xff]  ;;  %v6610_v19 = vld [vmem:[%s5922_s20 + $0xf2] sm:$0xff] }
  0x8b   : > { %5007 = vmatmul.mubr.msk.f32.gmra.mrb[24].mxu1 %vm279_vm0, %v223_v18  ;;  %5290 = vmatmul.mubr.msk.f32.gmra.mrb[6].mxu0 %vm279_vm0, %v6102_v29  ;;  %v228_v29 = vld [vmem:[%s5922_s20 + $0xf0] sm:$0xff]  ;;  %v3148_v18 = vld [vmem:[%s5922_s20 + $0x85] sm:$0xff] }
  0x8c   : > { %5009 = vmatprep.mubr.msk.f32.mxu1 %vm279_vm0, %v224_v21  ;;  %5292 = vmatprep.mubr.msk.f32.mxu0 %vm279_vm0, %v6106_v31  ;;  %v229_v31 = vld [vmem:[%s5922_s20 + $0xf8] sm:$0xff] }
  0x8d   : > { %v6619_v21 = vld [vmem:[%s5922_s20 + $0xfa] sm:$0xff] }
  0x8f   : > { %5010 = vmatmul.mubr.msk.f32.gmra.mrb[26].mxu1 %vm279_vm0, %v225_v23  ;;  %5293 = vmatmul.mubr.msk.f32.gmra.mrb[8].mxu0 %vm279_vm0, %v6116_v33  ;;  %v230_v33 = vld [vmem:[%s5922_s20 + $0x100] sm:$0xff]  ;;  %v3149_v23 = vld [vmem:[%s5922_s20 + $0x8d] sm:$0xff] }
  0x90   : > { %5012 = vmatprep.mubr.msk.f32.mxu1 %vm279_vm0, %v226_v25  ;;  %5295 = vmatprep.mubr.msk.f32.mxu0 %vm279_vm0, %v6120_v35  ;;  %v231_v35 = vld [vmem:[%s5922_s20 + $0x108] sm:$0xff] }
  0x91   : > { %v6624_v25 = vld [vmem:[%s5922_s20 + $0x102] sm:$0xff] }
  0x93   : > { %5013 = vmatmul.mubr.msk.f32.gmra.mrb[28].mxu1 %vm279_vm0, %v227_v27  ;;  %5296 = vmatmul.mubr.msk.f32.gmra.mrb[10].mxu0 %vm279_vm0, %v6130_v37  ;;  %v232_v37 = vld [vmem:[%s5922_s20 + $0x110] sm:$0xff] }
  0x94   : > { %5015 = vmatprep.mubr.msk.f32.mxu1 %vm279_vm0, %v228_v29  ;;  %5298 = vmatprep.mubr.msk.f32.mxu0 %vm279_vm0, %v6134_v40  ;;  %v233_v40 = vld [vmem:[%s5922_s20 + $0x118] sm:$0xff]  ;;  %v6633_v29 = vld [vmem:[%s5922_s20 + $0x10a] sm:$0xff] }
  0x95   : > { %v3150_v27 = vld [vmem:[%s5922_s20 + $0x95] sm:$0xff] }
  0x97   : > { %5016 = vmatmul.mubr.msk.f32.gmra.mrb[30].mxu1 %vm279_vm0, %v229_v31  ;;  %5299 = vmatmul.mubr.msk.f32.gmra.mrb[12].mxu0 %vm279_vm0, %v6144_v42  ;;  %v986_v42 = vld [vmem:[%s5922_s20 + $0x2] sm:$0xff] }
  0x98   : > { %5018 = vmatprep.mubr.msk.f32.mxu1 %vm279_vm0, %v230_v33  ;;  %5301 = vmatprep.mubr.msk.f32.mxu0 %vm279_vm0, %v6148_v44  ;;  %v4298_v44 = vld [vmem:[%s7055_s1 + $0x70] sm:$0xff]  ;;  %v3151_v31 = vld [vmem:[%s5922_s20 + $0x9d] sm:$0xff] }
  0x99   : > { %v5486_v58 = vpack.c.bf16 %v4299_v57, %v4298_v44  ;;  %v6638_v33 = vld [vmem:[%s5922_s20 + $0x112] sm:$0xff]  ;;  %v3155_v44 = vld [vmem:[%s5922_s20 + $0xbd] sm:$0xff]  ;;  %v3156_v57 = vld [vmem:[%s5922_s20 + $0xc5] sm:$0xff] }
  0x9b   : > { %5019 = vmatmul.mubr.msk.f32.gmra.mrb[32].mxu1 %vm279_vm0, %v231_v35  ;;  %5302 = vmatmul.mubr.msk.f32.gmra.mrb[14].mxu0 %vm279_vm0, %v6158_v46  ;;  %v987_v46 = vld [vmem:[%s5922_s20 + $0xa] sm:$0xff] }
  0x9c   : > { %5021 = vmatprep.mubr.msk.f32.mxu1 %vm279_vm0, %v232_v37  ;;  %5304 = vmatprep.mubr.msk.f32.mxu0 %vm279_vm0, %v6162_v48  ;;  %v6405_v48 = vld [vmem:[%s5922_s20 + $0x12] sm:$0xff]  ;;  %v3152_v35 = vld [vmem:[%s5922_s20 + $0xa5] sm:$0xff]  ;;  %v6647_v37 = vld [vmem:[%s5922_s20 + $0x11a] sm:$0xff] }
  0x9f   : > { %5022 = vmatmul.mubr.msk.f32.gmra.mrb[34].mxu1 %vm279_vm0, %v233_v40  ;;  %5305 = vmatmul.mubr.msk.f32.gmra.mrb[16].mxu0 %vm279_vm0, %v6178_v52  ;;  %v6419_v52 = vld [vmem:[%s5922_s20 + $0x22] sm:$0xff]  ;;  %v3153_v40 = vld [vmem:[%s5922_s20 + $0xad] sm:$0xff] }
  0xa0   : > { %5032 = vmatprep.mubr.msk.f32.mxu1 %vm279_vm0, %v986_v42  ;;  %5307 = vmatprep.mubr.msk.f32.mxu0 %vm279_vm0, %v6182_v54  ;;  %v6428_v54 = vld [vmem:[%s5922_s20 + $0x2a] sm:$0xff]  ;;  %v3154_v42 = vld [vmem:[%s5922_s20 + $0xb5] sm:$0xff] }
  0xa3   : > { %5033 = vmatmul.mubr.msk.f32.vlgmr.msra.gmra.mrb[0].mxu1 %vm279_vm0, %v987_v46  ;;  %5308 = vmatmul.mubr.msk.f32.gmra.mrb[18].mxu0 %vm279_vm0, %v6199_v59  ;;  %v6433_v59 = vld [vmem:[%s5922_s20 + $0x32] sm:$0xff] }
  0xa4   : > { %5485 = vmatpush3.bf16.msra.mxu1 %v6205_v62  ;;  %5035 = vmatprep.mubr.msk.f32.mxu1 %vm279_vm0, %v6405_v48  ;;  %v6448_v62 = vld [vmem:[%s5922_s20 + $0x42] sm:$0xff]  ;;  %v3157_v46 = vld [vmem:[%s5922_s20 + $0xcd] sm:$0xff] }
  0xa5   : > { %5310 = vmatprep.mubr.msk.f32.mxu0 %vm279_vm0, %v6203_v61  ;;  %5487 = vmatprep.subr.bf16.mxu1 %v5486_v58  ;;  %v6443_v61 = vld [vmem:[%s5922_s20 + $0x3a] sm:$0xff] }
  0xa7   : > { %5036 = vmatmul.mubr.msk.f32.gmra.mrb[2].mxu1 %vm279_vm0, %v6412_v60  ;;  %5311 = vmatmul.mubr.msk.f32.gmra.mrb[20].mxu0 %vm279_vm0, %v6215_v63  ;;  %v6462_v63 = vld [vmem:[%s5922_s20 + $0x52] sm:$0xff] }
  0xa8   : > { %5038 = vmatprep.mubr.msk.f32.mxu1 %vm279_vm0, %v6419_v52  ;;  %5313 = vmatprep.mubr.msk.f32.mxu0 %vm279_vm0, %v6219_v1  ;;  %v6476_v1 = vld [vmem:[%s5922_s20 + $0x62] sm:$0xff] }
  0xa9   : > { %5489 = vmatpush3.bf16.msra.mxu1 %v5486_v58  ;;  %v3160_v58 = vld [vmem:[%s5922_s20 + $0xe5] sm:$0xff] }
  0xaa   : > { %5530 = vmatprep.subr.bf16.mxu1 %v5891_v7 }
  0xab   : > { %5039 = vmatmul.mubr.msk.f32.gmra.mrb[4].mxu1 %vm279_vm0, %v6428_v54  ;;  %5314 = vmatmul.mubr.msk.f32.gmra.mrb[22].mxu0 %vm279_vm0, %v6230_v3  ;;  %v6490_v3 = vld [vmem:[%s5922_s20 + $0x72] sm:$0xff] }
  0xac   : > { %5041 = vmatprep.mubr.msk.f32.mxu1 %vm279_vm0, %v6433_v59  ;;  %5316 = vmatprep.mubr.msk.f32.mxu0 %vm279_vm0, %v6234_v5  ;;  %v6504_v5 = vld [vmem:[%s5922_s20 + $0x82] sm:$0xff] }
  0xaf   : > { %5042 = vmatmul.mubr.msk.f32.gmra.mrb[6].mxu1 %vm279_vm0, %v6443_v61  ;;  %5317 = vmatmul.mubr.msk.f32.gmra.mrb[24].mxu0 %vm279_vm0, %v6244_v8  ;;  %v6514_v8 = vld [vmem:[%s5922_s20 + $0x8a] sm:$0xff] }
  0xb0   : > { %5044 = vmatprep.mubr.msk.f32.mxu1 %vm279_vm0, %v6448_v62  ;;  %5319 = vmatprep.mubr.msk.f32.mxu0 %vm279_vm0, %v6248_v11  ;;  %v6519_v11 = vld [vmem:[%s5922_s20 + $0x92] sm:$0xff] }
  0xb3   : > { %5045 = vmatmul.mubr.msk.f32.gmra.mrb[8].mxu1 %vm279_vm0, %v6457_v39  ;;  %5320 = vmatmul.mubr.msk.f32.gmra.mrb[26].mxu0 %vm279_vm0, %v6258_v14  ;;  %v4498_v14 = vld [vmem:[%s7055_s1 + $0x110] sm:$0xff] }
  0xb4   : > { %5047 = vmatprep.mubr.msk.f32.mxu1 %vm279_vm0, %v6462_v63  ;;  %5322 = vmatprep.mubr.msk.f32.mxu0 %vm279_vm0, %v6262_v17  ;;  %v6534_v17 = vld [vmem:[%s5922_s20 + $0x9a] sm:$0xff] }
  0xb7   : > { %5048 = vmatmul.mubr.msk.f32.gmra.mrb[10].mxu1 %vm279_vm0, %v6471_v0  ;;  %5323 = vmatmul.mubr.msk.f32.gmra.mrb[28].mxu0 %vm279_vm0, %v6272_v22  ;;  %v6539_v22 = vld [vmem:[%s5922_s20 + $0xa2] sm:$0xff] }
  0xb8   : > { %5050 = vmatprep.mubr.msk.f32.mxu1 %vm279_vm0, %v6476_v1  ;;  %5325 = vmatprep.mubr.msk.f32.mxu0 %vm279_vm0, %v6276_v26  ;;  %v5526_v26 = vpack.c.bf16 %v4499_v15, %v4498_v14  ;;  %v3575_v14 = vld [vmem:[%s5922_s20 + $0x6e] sm:$0xff]  ;;  %v3576_v15 = vld [vmem:[%s5922_s20 + $0x76] sm:$0xff] }
  0xbb   : > { %5051 = vmatmul.mubr.msk.f32.gmra.mrb[12].mxu1 %vm279_vm0, %v6485_v2  ;;  %5326 = vmatmul.mubr.msk.f32.gmra.mrb[30].mxu0 %vm279_vm0, %v6286_v30  ;;  %v3139_v30 = vld [vmem:[%s5922_s20 + $0x3d] sm:$0xff] }
  0xbc   : > { %5053 = vmatprep.mubr.msk.f32.mxu1 %vm279_vm0, %v6490_v3  ;;  %5328 = vmatprep.mubr.msk.f32.mxu0 %vm279_vm0, %v6290_v34  ;;  %v3140_v34 = vld [vmem:[%s5922_s20 + $0x45] sm:$0xff] }
  0xbf   : > { %5054 = vmatmul.mubr.msk.f32.gmra.mrb[14].mxu1 %vm279_vm0, %v6499_v4  ;;  %5329 = vmatmul.mubr.msk.f32.gmra.mrb[32].mxu0 %vm279_vm0, %v6300_v38  ;;  %v3141_v38 = vld [vmem:[%s5922_s20 + $0x4d] sm:$0xff] }
  0xc0   : > { %5056 = vmatprep.mubr.msk.f32.mxu1 %vm279_vm0, %v6504_v5  ;;  %5331 = vmatprep.mubr.msk.f32.mxu0 %vm279_vm0, %v2740_v6  ;;  %v3570_v6 = vld [vmem:[%s5922_s20 + $0x46] sm:$0xff] }
  0xc3   : > { %5057 = vmatmul.mubr.msk.f32.gmra.mrb[16].mxu1 %vm279_vm0, %v6514_v8  ;;  %5332 = vmatmul.mubr.msk.f32.gmra.mrb[34].mxu0 %vm279_vm0, %v2741_v9  ;;  %v3572_v9 = vld [vmem:[%s5922_s20 + $0x56] sm:$0xff] }
  0xc4   : > { %5059 = vmatprep.mubr.msk.f32.mxu1 %vm279_vm0, %v6519_v11  ;;  %5342 = vmatprep.mubr.msk.f32.mxu0 %vm279_vm0, %v3136_v13  ;;  %v3574_v13 = vld [vmem:[%s5922_s20 + $0x66] sm:$0xff] }
  0xc7   : > { %5060 = vmatmul.mubr.msk.f32.gmra.mrb[18].mxu1 %vm279_vm0, %v6534_v17  ;;  %5343 = vmatmul.mubr.msk.f32.vlgmr.msra.gmra.mrb[0].mxu0 %vm279_vm0, %v3137_v20  ;;  %v3578_v20 = vld [vmem:[%s5922_s20 + $0x86] sm:$0xff] }
  0xc8   : > { %5062 = vmatprep.mubr.msk.f32.mxu1 %vm279_vm0, %v6539_v22  ;;  %5525 = vmatpush3.bf16.msra.mxu0 %v6332_v56  ;;  %v6605_v56 = vld [vmem:[%s5922_s20 + $0xea] sm:$0xff] }
  0xc9   : > { %5345 = vmatprep.mubr.msk.f32.mxu0 %vm279_vm0, %v3138_v24  ;;  %5527 = vmatprep.subr.bf16.mxu0 %v5526_v26  ;;  %v3580_v24 = vld [vmem:[%s5922_s20 + $0x96] sm:$0xff] }
  0xcb   : > { %5063 = vmatmul.mubr.msk.f32.gmra.mrb[20].mxu1 %vm279_vm0, %v6548_v28  ;;  %5346 = vmatmul.mubr.msk.f32.gmra.mrb[2].mxu0 %vm279_vm0, %v3139_v30  ;;  %v3582_v30 = vld [vmem:[%s5922_s20 + $0xa6] sm:$0xff] }
  0xcc   : > { %5065 = vmatprep.mubr.msk.f32.mxu1 %vm279_vm0, %v6554_v32  ;;  %5348 = vmatprep.mubr.msk.f32.mxu0 %vm279_vm0, %v3140_v34  ;;  %v3583_v34 = vld [vmem:[%s5922_s20 + $0xae] sm:$0xff] }
  0xcd   : > { %5529 = vmatpush3.bf16.msra.mxu0 %v5526_v26  ;;  %v3581_v26 = vld [vmem:[%s5922_s20 + $0x9e] sm:$0xff] }
  0xcf   : > { %5066 = vmatmul.mubr.msk.f32.gmra.mrb[22].mxu1 %vm279_vm0, %v6563_v36  ;;  %5349 = vmatmul.mubr.msk.f32.gmra.mrb[4].mxu0 %vm279_vm0, %v3141_v38  ;;  %v3584_v38 = vld [vmem:[%s5922_s20 + $0xb6] sm:$0xff] }
  0xd0   : > { %5068 = vmatprep.mubr.msk.f32.mxu1 %vm279_vm0, %v6568_v41  ;;  %5351 = vmatprep.mubr.msk.f32.mxu0 %vm279_vm0, %v3142_v43  ;;  %v3585_v43 = vld [vmem:[%s5922_s20 + $0xbe] sm:$0xff] }
  0xd3   : > { %5069 = vmatmul.mubr.msk.f32.gmra.mrb[24].mxu1 %vm279_vm0, %v6577_v45  ;;  %5352 = vmatmul.mubr.msk.f32.gmra.mrb[6].mxu0 %vm279_vm0, %v3143_v47  ;;  %v3586_v47 = vld [vmem:[%s5922_s20 + $0xc6] sm:$0xff] }
  0xd4   : > { %5071 = vmatprep.mubr.msk.f32.mxu1 %vm279_vm0, %v6582_v49  ;;  %5354 = vmatprep.mubr.msk.f32.mxu0 %vm279_vm0, %v3144_v50  ;;  %v3587_v50 = vld [vmem:[%s5922_s20 + $0xce] sm:$0xff] }
  0xd7   : > { %5072 = vmatmul.mubr.msk.f32.gmra.mrb[26].mxu1 %vm279_vm0, %v6591_v51  ;;  %5355 = vmatmul.mubr.msk.f32.gmra.mrb[8].mxu0 %vm279_vm0, %v3145_v53  ;;  %v3588_v53 = vld [vmem:[%s5922_s20 + $0xd6] sm:$0xff] }
  0xd8   : > { %5074 = vmatprep.mubr.msk.f32.mxu1 %vm279_vm0, %v6596_v10  ;;  %5357 = vmatprep.mubr.msk.f32.mxu0 %vm279_vm0, %v3146_v55  ;;  %v3589_v55 = vld [vmem:[%s5922_s20 + $0xde] sm:$0xff] }
  0xdb   : > { %5075 = vmatmul.mubr.msk.f32.gmra.mrb[28].mxu1 %vm279_vm0, %v6605_v56  ;;  %5358 = vmatmul.mubr.msk.f32.gmra.mrb[10].mxu0 %vm279_vm0, %v3147_v16  ;;  %v3590_v16 = vld [vmem:[%s5922_s20 + $0xe6] sm:$0xff] }
  0xdc   : > { %5077 = vmatprep.mubr.msk.f32.mxu1 %vm279_vm0, %v6610_v19  ;;  %5360 = vmatprep.mubr.msk.f32.mxu0 %vm279_vm0, %v3148_v18  ;;  %v3591_v18 = vld [vmem:[%s5922_s20 + $0xee] sm:$0xff] }
  0xdf   : > { %5078 = vmatmul.mubr.msk.f32.gmra.mrb[30].mxu1 %vm279_vm0, %v6619_v21  ;;  %5361 = vmatmul.mubr.msk.f32.gmra.mrb[12].mxu0 %vm279_vm0, %v3149_v23  ;;  %v3592_v23 = vld [vmem:[%s5922_s20 + $0xf6] sm:$0xff] }
  0xe0   : > { %5080 = vmatprep.mubr.msk.f32.mxu1 %vm279_vm0, %v6624_v25  ;;  %5363 = vmatprep.mubr.msk.f32.mxu0 %vm279_vm0, %v3150_v27  ;;  %v3593_v27 = vld [vmem:[%s5922_s20 + $0xfe] sm:$0xff] }
  0xe3   : > { %5081 = vmatmul.mubr.msk.f32.gmra.mrb[32].mxu1 %vm279_vm0, %v6633_v29  ;;  %5364 = vmatmul.mubr.msk.f32.gmra.mrb[14].mxu0 %vm279_vm0, %v3151_v31  ;;  %v3594_v31 = vld [vmem:[%s5922_s20 + $0x106] sm:$0xff] }
  0xe4   : > { %5083 = vmatprep.mubr.msk.f32.mxu1 %vm279_vm0, %v6638_v33  ;;  %5366 = vmatprep.mubr.msk.f32.mxu0 %vm279_vm0, %v3152_v35  ;;  %v3595_v35 = vld [vmem:[%s5922_s20 + $0x10e] sm:$0xff] }
  0xe7   : > { %5084 = vmatmul.mubr.msk.f32.gmra.mrb[34].mxu1 %vm279_vm0, %v6647_v37  ;;  %5367 = vmatmul.mubr.msk.f32.gmra.mrb[16].mxu0 %vm279_vm0, %v3153_v40  ;;  %v3596_v40 = vld [vmem:[%s5922_s20 + $0x116] sm:$0xff] }
  0xe8   : > { %5094 = vmatprep.mubr.msk.f32.mxu1 %vm279_vm0, %v6405_v48  ;;  %5369 = vmatprep.mubr.msk.f32.mxu0 %vm279_vm0, %v3154_v42  ;;  %v3158_v48 = vld [vmem:[%s5922_s20 + $0xd5] sm:$0xff]  ;;  %v1877_v42 = vld [vmem:[%s5922_s20 + $0x10b] sm:$0xff] }
  0xeb   : > { %5095 = vmatmul.mubr.msk.f32.vlgmr.msra.gmra.mrb[0].mxu1 %vm279_vm0, %v6412_v60  ;;  %5370 = vmatmul.mubr.msk.f32.gmra.mrb[18].mxu0 %vm279_vm0, %v3155_v44  ;;  %v3161_v60 = vld [vmem:[%s5922_s20 + $0xed] sm:$0xff]  ;;  %v3597_v44 = vld [vmem:[%s5922_s20 + $0x11e] sm:$0xff] }
  0xec   : > { %5532 = vmatpush3.bf16.msra.mxu1 %v5891_v7  ;;  %5097 = vmatprep.mubr.msk.f32.mxu1 %vm279_vm0, %v6419_v52  ;;  %v3159_v7 = vld [vmem:[%s5922_s20 + $0xdd] sm:$0xff]  ;;  %v3162_v52 = vld [vmem:[%s5922_s20 + $0xf5] sm:$0xff] }
  0xed   : > { %5372 = vmatprep.mubr.msk.f32.mxu0 %vm279_vm0, %v3156_v57  ;;  %5531 = vmatprep.subr.bf16.mxu1 %v5904_v12  ;;  %v1878_v57 = vld [vmem:[%s5922_s20 + $0x113] sm:$0xff] }
  0xef   : > { %5098 = vmatmul.mubr.msk.f32.gmra.mrb[2].mxu1 %vm279_vm0, %v6428_v54  ;;  %5373 = vmatmul.mubr.msk.f32.gmra.mrb[20].mxu0 %vm279_vm0, %v3157_v46  ;;  %v3164_v54 = vld [vmem:[%s5922_s20 + $0x105] sm:$0xff] }
  0xf0   : > { %5100 = vmatprep.mubr.msk.f32.mxu1 %vm279_vm0, %v6433_v59  ;;  %5375 = vmatprep.mubr.msk.f32.mxu0 %vm279_vm0, %v3158_v48  ;;  %v3165_v59 = vld [vmem:[%s5922_s20 + $0x10d] sm:$0xff]  ;;  %v1879_v48 = vld [vmem:[%s5922_s20 + $0x11b] sm:$0xff] }
  0xf1   : > { %5533 = vmatpush3.bf16.msra.mxu1 %v5904_v12  ;;  %v3163_v12 = vld [vmem:[%s5922_s20 + $0xfd] sm:$0xff]  ;;  %v3598_v46 = vld [vmem:[%s5922_s20 + $0x126] sm:$0xff] }
  0xf3   : > { %5101 = vmatmul.mubr.msk.f32.gmra.mrb[4].mxu1 %vm279_vm0, %v6443_v61  ;;  %5376 = vmatmul.mubr.msk.f32.gmra.mrb[22].mxu0 %vm279_vm0, %v3159_v7  ;;  %v3166_v61 = vld [vmem:[%s5922_s20 + $0x115] sm:$0xff] }
  0xf4   : > { %5103 = vmatprep.mubr.msk.f32.mxu1 %vm279_vm0, %v6448_v62  ;;  %5378 = vmatprep.mubr.msk.f32.mxu0 %vm279_vm0, %v3160_v58  ;;  %v3167_v62 = vld [vmem:[%s5922_s20 + $0x11d] sm:$0xff]  ;;  %v3599_v7 = vld [vmem:[%s5922_s20 + $0x12e] sm:$0xff] }
  0xf5   : > { %v1880_v58 = vld [vmem:[%s5922_s20 + $0x123] sm:$0xff] }
  0xf7   : > { %5104 = vmatmul.mubr.msk.f32.gmra.mrb[6].mxu1 %vm279_vm0, %v6457_v39  ;;  %5379 = vmatmul.mubr.msk.f32.gmra.mrb[24].mxu0 %vm279_vm0, %v3161_v60  ;;  %v3168_v39 = vld [vmem:[%s5922_s20 + $0x125] sm:$0xff]  ;;  %v3600_v60 = vld [vmem:[%s5922_s20 + $0x136] sm:$0xff] }
  0xf8   : > { %5106 = vmatprep.mubr.msk.f32.mxu1 %vm279_vm0, %v6462_v63  ;;  %5381 = vmatprep.mubr.msk.f32.mxu0 %vm279_vm0, %v3162_v52  ;;  %v3169_v63 = vld [vmem:[%s5922_s20 + $0x12d] sm:$0xff] }
  0xf9   : > { %v1881_v52 = vld [vmem:[%s5922_s20 + $0x12b] sm:$0xff] }
  0xfb   : > { %5107 = vmatmul.mubr.msk.f32.gmra.mrb[8].mxu1 %vm279_vm0, %v6471_v0  ;;  %5382 = vmatmul.mubr.msk.f32.gmra.mrb[26].mxu0 %vm279_vm0, %v3163_v12  ;;  %v3170_v0 = vld [vmem:[%s5922_s20 + $0x135] sm:$0xff]  ;;  %v3601_v12 = vld [vmem:[%s5922_s20 + $0x13e] sm:$0xff] }
  0xfc   : > { %5109 = vmatprep.mubr.msk.f32.mxu1 %vm279_vm0, %v6476_v1  ;;  %5384 = vmatprep.mubr.msk.f32.mxu0 %vm279_vm0, %v3164_v54  ;;  %v3171_v1 = vld [vmem:[%s5922_s20 + $0x13d] sm:$0xff] }
  0xff   : > { %5110 = vmatmul.mubr.msk.f32.gmra.mrb[10].mxu1 %vm279_vm0, %v6485_v2  ;;  %5385 = vmatmul.mubr.msk.f32.gmra.mrb[28].mxu0 %vm279_vm0, %v3165_v59  ;;  %v3566_v2 = vld [vmem:[%s5922_s20 + $0x26] sm:$0xff] }
 0x100   : > { %5112 = vmatprep.mubr.msk.f32.mxu1 %vm279_vm0, %v6490_v3  ;;  %5387 = vmatprep.mubr.msk.f32.mxu0 %vm279_vm0, %v3166_v61  ;;  %v3567_v3 = vld [vmem:[%s5922_s20 + $0x2e] sm:$0xff] }
 0x103   : > { %5113 = vmatmul.mubr.msk.f32.gmra.mrb[12].mxu1 %vm279_vm0, %v6499_v4  ;;  %5388 = vmatmul.mubr.msk.f32.gmra.mrb[30].mxu0 %vm279_vm0, %v3167_v62  ;;  %v3568_v4 = vld [vmem:[%s5922_s20 + $0x36] sm:$0xff] }
 0x104   : > { %5115 = vmatprep.mubr.msk.f32.mxu1 %vm279_vm0, %v6504_v5  ;;  %5390 = vmatprep.mubr.msk.f32.mxu0 %vm279_vm0, %v3168_v39  ;;  %v3569_v5 = vld [vmem:[%s5922_s20 + $0x3e] sm:$0xff] }
 0x107   : > { %5116 = vmatmul.mubr.msk.f32.gmra.mrb[14].mxu1 %vm279_vm0, %v6514_v8  ;;  %5391 = vmatmul.mubr.msk.f32.gmra.mrb[32].mxu0 %vm279_vm0, %v3169_v63  ;;  %v3571_v8 = vld [vmem:[%s5922_s20 + $0x4e] sm:$0xff] }
 0x108   : > { %5118 = vmatprep.mubr.msk.f32.mxu1 %vm279_vm0, %v6519_v11  ;;  %5393 = vmatprep.mubr.msk.f32.mxu0 %vm279_vm0, %v3170_v0  ;;  %v3573_v11 = vld [vmem:[%s5922_s20 + $0x5e] sm:$0xff] }
 0x10b   : > { %5119 = vmatmul.mubr.msk.f32.gmra.mrb[16].mxu1 %vm279_vm0, %v6534_v17  ;;  %5394 = vmatmul.mubr.msk.f32.gmra.mrb[34].mxu0 %vm279_vm0, %v3171_v1  ;;  %v3577_v17 = vld [vmem:[%s5922_s20 + $0x7e] sm:$0xff] }
 0x10c   : > { %5121 = vmatprep.mubr.msk.f32.mxu1 %vm279_vm0, %v6539_v22  ;;  %5404 = vmatprep.mubr.msk.f32.mxu0 %vm279_vm0, %v3566_v2  ;;  %v3579_v22 = vld [vmem:[%s5922_s20 + $0x8e] sm:$0xff] }
 0x10f   : > { %5122 = vmatmul.mubr.msk.f32.gmra.mrb[18].mxu1 %vm279_vm0, %v6548_v28  ;;  %5405 = vmatmul.mubr.msk.f32.vlgmr.msra.gmra.mrb[0].mxu0 %vm279_vm0, %v3567_v3  ;;  %v1450_v28 = vld [vmem:[%s5922_s20 + $0x122] sm:$0xff] }
 0x110   : > { %5124 = vmatprep.mubr.msk.f32.mxu1 %vm279_vm0, %v6554_v32  ;;  %5407 = vmatprep.mubr.msk.f32.mxu0 %vm279_vm0, %v3568_v4  ;;  %v1451_v32 = vld [vmem:[%s5922_s20 + $0x12a] sm:$0xff] }
 0x113   : > { %5125 = vmatmul.mubr.msk.f32.gmra.mrb[20].mxu1 %vm279_vm0, %v6563_v36  ;;  %5408 = vmatmul.mubr.msk.f32.gmra.mrb[2].mxu0 %vm279_vm0, %v3569_v5  ;;  %v1864_v36 = vld [vmem:[%s5922_s20 + $0xa3] sm:$0xff] }
 0x114   : > { %5127 = vmatprep.mubr.msk.f32.mxu1 %vm279_vm0, %v6568_v41  ;;  %5410 = vmatprep.mubr.msk.f32.mxu0 %vm279_vm0, %v3570_v6  ;;  %v1865_v41 = vld [vmem:[%s5922_s20 + $0xab] sm:$0xff] }
 0x117   : > { %5128 = vmatmul.mubr.msk.f32.gmra.mrb[22].mxu1 %vm279_vm0, %v6577_v45  ;;  %5411 = vmatmul.mubr.msk.f32.gmra.mrb[4].mxu0 %vm279_vm0, %v3571_v8  ;;  %v1866_v45 = vld [vmem:[%s5922_s20 + $0xb3] sm:$0xff] }
 0x118   : > { %5130 = vmatprep.mubr.msk.f32.mxu1 %vm279_vm0, %v6582_v49  ;;  %5413 = vmatprep.mubr.msk.f32.mxu0 %vm279_vm0, %v3572_v9  ;;  %v1867_v49 = vld [vmem:[%s5922_s20 + $0xbb] sm:$0xff] }
 0x11b   : > { %5131 = vmatmul.mubr.msk.f32.gmra.mrb[24].mxu1 %vm279_vm0, %v6591_v51  ;;  %5414 = vmatmul.mubr.msk.f32.gmra.mrb[6].mxu0 %vm279_vm0, %v3573_v11  ;;  %v1868_v51 = vld [vmem:[%s5922_s20 + $0xc3] sm:$0xff] }
 0x11c   : > { %5133 = vmatprep.mubr.msk.f32.mxu1 %vm279_vm0, %v6596_v10  ;;  %5416 = vmatprep.mubr.msk.f32.mxu0 %vm279_vm0, %v3574_v13  ;;  %v1869_v10 = vld [vmem:[%s5922_s20 + $0xcb] sm:$0xff] }
 0x11f   : > { %5134 = vmatmul.mubr.msk.f32.gmra.mrb[26].mxu1 %vm279_vm0, %v6605_v56  ;;  %5417 = vmatmul.mubr.msk.f32.gmra.mrb[8].mxu0 %vm279_vm0, %v3575_v14  ;;  %v1870_v56 = vld [vmem:[%s5922_s20 + $0xd3] sm:$0xff] }
 0x120   : > { %5136 = vmatprep.mubr.msk.f32.mxu1 %vm279_vm0, %v6610_v19  ;;  %5419 = vmatprep.mubr.msk.f32.mxu0 %vm279_vm0, %v3576_v15  ;;  %v1871_v19 = vld [vmem:[%s5922_s20 + $0xdb] sm:$0xff] }
 0x123   : > { %5137 = vmatmul.mubr.msk.f32.gmra.mrb[28].mxu1 %vm279_vm0, %v6619_v21  ;;  %5420 = vmatmul.mubr.msk.f32.gmra.mrb[10].mxu0 %vm279_vm0, %v3577_v17  ;;  %v1872_v21 = vld [vmem:[%s5922_s20 + $0xe3] sm:$0xff]  ;;  %v6889_v17 = vld [vmem:[%s7056_s2] ss:$0 sm:$0xff] }
 0x124   : > { %5139 = vmatprep.mubr.msk.f32.mxu1 %vm279_vm0, %v6624_v25  ;;  %5422 = vmatprep.mubr.msk.f32.mxu0 %vm279_vm0, %v3578_v20  ;;  %v1873_v25 = vld [vmem:[%s5922_s20 + $0xeb] sm:$0xff] }
 0x127   : > { %5140 = vmatmul.mubr.msk.f32.gmra.mrb[30].mxu1 %vm279_vm0, %v6633_v29  ;;  %5423 = vmatmul.mubr.msk.f32.gmra.mrb[12].mxu0 %vm279_vm0, %v3579_v22  ;;  %v1874_v29 = vld [vmem:[%s5922_s20 + $0xf3] sm:$0xff] }
 0x128   : > { %5142 = vmatprep.mubr.msk.f32.mxu1 %vm279_vm0, %v6638_v33  ;;  %5425 = vmatprep.mubr.msk.f32.mxu0 %vm279_vm0, %v3580_v24  ;;  %v1875_v33 = vld [vmem:[%s5922_s20 + $0xfb] sm:$0xff] }
 0x129   : > { %v6894_v24 = vld [vmem:[%s7057_s3] ss:$0 sm:$0xff] }
 0x12b   : > { %5143 = vmatmul.mubr.msk.f32.gmra.mrb[32].mxu1 %vm279_vm0, %v6647_v37  ;;  %5426 = vmatmul.mubr.msk.f32.gmra.mrb[14].mxu0 %vm279_vm0, %v3581_v26  ;;  %v1876_v37 = vld [vmem:[%s5922_s20 + $0x103] sm:$0xff]  ;;  %s5823_s20 = smul.u32 288, %s7060_s16 }
 0x12c   : > { %5145 = vmatprep.mubr.msk.f32.mxu1 %vm279_vm0, %v1450_v28  ;;  %5428 = vmatprep.mubr.msk.f32.mxu0 %vm279_vm0, %v3582_v30 }
 0x12d   : > { %s6900_s16 = scalar_lea.vmem %s7058_s4, %s5823_s20 }
 0x12f   : > { %5146 = vmatmul.mubr.msk.f32.gmra.mrb[34].mxu1 %vm279_vm0, %v1451_v32  ;;  %5429 = vmatmul.mubr.msk.f32.gmra.mrb[16].mxu0 %vm279_vm0, %v3583_v34 }
 0x130   : > { %5183 = vmatprep.mubr.msk.f32.mxu1 %vm279_vm0, %v1864_v36  ;;  %5431 = vmatprep.mubr.msk.f32.mxu0 %vm279_vm0, %v3584_v38 }
 0x133   : > { %5184 = vmatmul.mubr.msk.f32.vlgmr.msra.gmra.mrb[18].mxu1 %vm279_vm0, %v1865_v41  ;;  %5432 = vmatmul.mubr.msk.f32.gmra.mrb[18].mxu0 %vm279_vm0, %v3585_v43 }
 0x134   : > { %5186 = vmatprep.mubr.msk.f32.mxu1 %vm279_vm0, %v1866_v45  ;;  %5434 = vmatprep.mubr.msk.f32.mxu0 %vm279_vm0, %v3586_v47 }
 0x137   : > { %5187 = vmatmul.mubr.msk.f32.gmra.mrb[20].mxu1 %vm279_vm0, %v1867_v49  ;;  %5435 = vmatmul.mubr.msk.f32.gmra.mrb[20].mxu0 %vm279_vm0, %v3587_v50 }
 0x138   : > { %5189 = vmatprep.mubr.msk.f32.mxu1 %vm279_vm0, %v1868_v51  ;;  %5437 = vmatprep.mubr.msk.f32.mxu0 %vm279_vm0, %v3588_v53 }
 0x13b   : > { %5190 = vmatmul.mubr.msk.f32.gmra.mrb[22].mxu1 %vm279_vm0, %v1869_v10  ;;  %5438 = vmatmul.mubr.msk.f32.gmra.mrb[22].mxu0 %vm279_vm0, %v3589_v55 }
 0x13c   : > { %5192 = vmatprep.mubr.msk.f32.mxu1 %vm279_vm0, %v1870_v56  ;;  %5440 = vmatprep.mubr.msk.f32.mxu0 %vm279_vm0, %v3590_v16 }
 0x13f   : > { %5193 = vmatmul.mubr.msk.f32.gmra.mrb[24].mxu1 %vm279_vm0, %v1871_v19  ;;  %5441 = vmatmul.mubr.msk.f32.gmra.mrb[24].mxu0 %vm279_vm0, %v3591_v18 }
 0x140   : > { %5195 = vmatprep.mubr.msk.f32.mxu1 %vm279_vm0, %v1872_v21  ;;  %5443 = vmatprep.mubr.msk.f32.mxu0 %vm279_vm0, %v3592_v23 }
 0x143   : > { %5196 = vmatmul.mubr.msk.f32.gmra.mrb[26].mxu1 %vm279_vm0, %v1873_v25  ;;  %5444 = vmatmul.mubr.msk.f32.gmra.mrb[26].mxu0 %vm279_vm0, %v3593_v27 }
 0x144   : > { %5198 = vmatprep.mubr.msk.f32.mxu1 %vm279_vm0, %v1874_v29  ;;  %5446 = vmatprep.mubr.msk.f32.mxu0 %vm279_vm0, %v3594_v31 }
 0x147   : > { %5199 = vmatmul.mubr.msk.f32.gmra.mrb[28].mxu1 %vm279_vm0, %v1875_v33  ;;  %5447 = vmatmul.mubr.msk.f32.gmra.mrb[28].mxu0 %vm279_vm0, %v3595_v35 }
 0x148   : > { %5201 = vmatprep.mubr.msk.f32.mxu1 %vm279_vm0, %v1876_v37  ;;  %5449 = vmatprep.mubr.msk.f32.mxu0 %vm279_vm0, %v3596_v40 }
 0x14b   : > { %5202 = vmatmul.mubr.msk.f32.gmra.mrb[30].mxu1 %vm279_vm0, %v1877_v42  ;;  %5450 = vmatmul.mubr.msk.f32.gmra.mrb[30].mxu0 %vm279_vm0, %v3597_v44 }
 0x14c   : > { %5204 = vmatprep.mubr.msk.f32.mxu1 %vm279_vm0, %v1878_v57  ;;  %5452 = vmatprep.mubr.msk.f32.mxu0 %vm279_vm0, %v3598_v46 }
 0x14f   : > { %5205 = vmatmul.mubr.msk.f32.gmra.mrb[32].mxu1 %vm279_vm0, %v1879_v48  ;;  %5453 = vmatmul.mubr.msk.f32.gmra.mrb[32].mxu0 %vm279_vm0, %v3599_v7 }
 0x150   : > { %5207 = vmatprep.mubr.msk.f32.mxu1 %vm279_vm0, %v1880_v58  ;;  %5455 = vmatprep.mubr.msk.f32.mxu0 %vm279_vm0, %v3600_v60 }
 0x153   : > { %5208 = vmatmul.mubr.msk.f32.gmra.mrb[34].mxu1 %vm279_vm0, %v1881_v52  ;;  %5456 = vmatmul.mubr.msk.f32.gmra.mrb[34].mxu0 %vm279_vm0, %v3601_v12 }
 0x1be   : > { %v5096_v54 = vpop.f32.mrb[0].mxu1 }
 0x1bf   : > { %v1631_v59 = vpop.f32.mrb[1].mxu1 }
 0x1c2   : > { %v5099_v61 = vpop.f32.mrb[2].mxu1 }
 0x1c3   : > { %v1641_v62 = vpop.f32.mrb[3].mxu1 }
 0x1c6   : > { %v5102_v39 = vpop.f32.mrb[4].mxu1 }
 0x1c7   : > { %v1651_v63 = vpop.f32.mrb[5].mxu1 }
 0x1ca   : > { %v5105_v0 = vpop.f32.mrb[6].mxu1 }
 0x1cb   : > { %v1661_v1 = vpop.f32.mrb[7].mxu1 }
 0x1ce   : > { %v5108_v2 = vpop.f32.mrb[8].mxu1 }
 0x1cf   : > { %v1671_v3 = vpop.f32.mrb[9].mxu1 }
 0x1d2   : > { %v5111_v4 = vpop.f32.mrb[10].mxu1 }
 0x1d3   : > { %v1681_v5 = vpop.f32.mrb[11].mxu1 }
 0x1d6   : > { %v6873_v6 = vpop.f32.mrb[12].mxu1 }
 0x1d7   : > { %v6875_v8 = vpop.f32.mrb[13].mxu1 }
 0x1da   : > { %v6877_v9 = vpop.f32.mrb[14].mxu1 }
 0x1db   : > { %v6879_v11 = vpop.f32.mrb[15].mxu1 }
 0x1de   : > { %v6881_v13 = vpop.f32.mrb[16].mxu1 }
 0x1df   : > { %v6883_v14 = vpop.f32.mrb[17].mxu1 }
 0x1e2   : > { %v5406_v15 = vpop.f32.mrb[0].mxu0 }
 0x1e3   : > { %v5534_v20 = vadd.f32 %v5406_v15, %v5096_v54  ;;  %v3781_v22 = vpop.f32.mrb[1].mxu0 }
 0x1e4   : > { %v5535_v26 = vadd.f32 %v3781_v22, %v1631_v59 }
 0x1e5   : > { %v4004_v28 = vmul.f32 %v5534_v20, %v6889_v17 }
 0x1e6   : > { %v4003_v30 = vmul.f32 %v5535_v26, %v6889_v17  ;;  %v5409_v32 = vpop.f32.mrb[2].mxu0 }
 0x1e7   : > { %v4047_v34 = vadd.f32 %v6894_v24, %v4004_v28  ;;  %v5536_v36 = vadd.f32 %v5409_v32, %v5099_v61  ;;  %v3791_v38 = vpop.f32.mrb[3].mxu0 }
 0x1e8   : > { %v4046_v41 = vadd.f32 %v6894_v24, %v4003_v30  ;;  %v5537_v43 = vadd.f32 %v3791_v38, %v1641_v62 }
 0x1e9   : > { %4083 = vst.msk [vmem:[%s6900_s16 + $0x8] sm:$0xff] %vm279_vm0, %v4047_v34  ;;  %v4006_v45 = vmul.f32 %v5536_v36, %v6889_v17 }
 0x1ea   : > { %4082 = vst.msk [vmem:[%s6900_s16] sm:$0xff] %vm279_vm0, %v4046_v41  ;;  %v4005_v47 = vmul.f32 %v5537_v43, %v6889_v17  ;;  %v5412_v49 = vpop.f32.mrb[4].mxu0 }
 0x1eb   : > { %v4049_v50 = vadd.f32 %v6894_v24, %v4006_v45  ;;  %v5538_v51 = vadd.f32 %v5412_v49, %v5102_v39  ;;  %v3801_v53 = vpop.f32.mrb[5].mxu0 }
 0x1ec   : > { %v4048_v10 = vadd.f32 %v6894_v24, %v4005_v47  ;;  %v5539_v55 = vadd.f32 %v3801_v53, %v1651_v63 }
 0x1ed   : > { %4085 = vst.msk [vmem:[%s6900_s16 + $0x18] sm:$0xff] %vm279_vm0, %v4049_v50  ;;  %v4008_v56 = vmul.f32 %v5538_v51, %v6889_v17 }
 0x1ee   : > { %4084 = vst.msk [vmem:[%s6900_s16 + $0x10] sm:$0xff] %vm279_vm0, %v4048_v10  ;;  %v4007_v16 = vmul.f32 %v5539_v55, %v6889_v17  ;;  %v5415_v19 = vpop.f32.mrb[6].mxu0 }
 0x1ef   : > { %v4051_v18 = vadd.f32 %v6894_v24, %v4008_v56  ;;  %v5540_v21 = vadd.f32 %v5415_v19, %v5105_v0  ;;  %v3811_v23 = vpop.f32.mrb[7].mxu0 }
 0x1f0   : > { %v4050_v25 = vadd.f32 %v6894_v24, %v4007_v16  ;;  %v5541_v27 = vadd.f32 %v3811_v23, %v1661_v1 }
 0x1f1   : > { %4087 = vst.msk [vmem:[%s6900_s16 + $0x28] sm:$0xff] %vm279_vm0, %v4051_v18  ;;  %v4010_v29 = vmul.f32 %v5540_v21, %v6889_v17 }
 0x1f2   : > { %4086 = vst.msk [vmem:[%s6900_s16 + $0x20] sm:$0xff] %vm279_vm0, %v4050_v25  ;;  %v4009_v31 = vmul.f32 %v5541_v27, %v6889_v17  ;;  %v5418_v33 = vpop.f32.mrb[8].mxu0 }
 0x1f3   : > { %v4053_v35 = vadd.f32 %v6894_v24, %v4010_v29  ;;  %v5542_v37 = vadd.f32 %v5418_v33, %v5108_v2  ;;  %v3821_v40 = vpop.f32.mrb[9].mxu0 }
 0x1f4   : > { %v4052_v42 = vadd.f32 %v6894_v24, %v4009_v31  ;;  %v5543_v44 = vadd.f32 %v3821_v40, %v1671_v3 }
 0x1f5   : > { %4089 = vst.msk [vmem:[%s6900_s16 + $0x38] sm:$0xff] %vm279_vm0, %v4053_v35  ;;  %v4012_v57 = vmul.f32 %v5542_v37, %v6889_v17 }
 0x1f6   : > { %4088 = vst.msk [vmem:[%s6900_s16 + $0x30] sm:$0xff] %vm279_vm0, %v4052_v42  ;;  %v4011_v46 = vmul.f32 %v5543_v44, %v6889_v17  ;;  %v5421_v48 = vpop.f32.mrb[10].mxu0 }
 0x1f7   : > { %v4055_v7 = vadd.f32 %v6894_v24, %v4012_v57  ;;  %v5544_v58 = vadd.f32 %v5421_v48, %v5111_v4  ;;  %v3831_v60 = vpop.f32.mrb[11].mxu0 }
 0x1f8   : > { %v4054_v52 = vadd.f32 %v6894_v24, %v4011_v46  ;;  %v5545_v12 = vadd.f32 %v3831_v60, %v1681_v5 }
 0x1f9   : > { %4091 = vst.msk [vmem:[%s6900_s16 + $0x48] sm:$0xff] %vm279_vm0, %v4055_v7  ;;  %v4014_v54 = vmul.f32 %v5544_v58, %v6889_v17 }
 0x1fa   : > { %4090 = vst.msk [vmem:[%s6900_s16 + $0x40] sm:$0xff] %vm279_vm0, %v4054_v52  ;;  %v4013_v59 = vmul.f32 %v5545_v12, %v6889_v17  ;;  %v5424_v61 = vpop.f32.mrb[12].mxu0 }
 0x1fb   : > { %v4057_v62 = vadd.f32 %v6894_v24, %v4014_v54  ;;  %v5546_v39 = vadd.f32 %v5424_v61, %v6873_v6  ;;  %v3841_v63 = vpop.f32.mrb[13].mxu0 }
 0x1fc   : > { %v4056_v0 = vadd.f32 %v6894_v24, %v4013_v59  ;;  %v5547_v1 = vadd.f32 %v3841_v63, %v6875_v8 }
 0x1fd   : > { %4093 = vst.msk [vmem:[%s6900_s16 + $0x58] sm:$0xff] %vm279_vm0, %v4057_v62  ;;  %v4016_v2 = vmul.f32 %v5546_v39, %v6889_v17 }
 0x1fe   : > { %4092 = vst.msk [vmem:[%s6900_s16 + $0x50] sm:$0xff] %vm279_vm0, %v4056_v0  ;;  %v4015_v3 = vmul.f32 %v5547_v1, %v6889_v17  ;;  %v5427_v4 = vpop.f32.mrb[14].mxu0 }
 0x1ff   : > { %v4059_v5 = vadd.f32 %v6894_v24, %v4016_v2  ;;  %v5548_v6 = vadd.f32 %v5427_v4, %v6877_v9  ;;  %v3851_v15 = vpop.f32.mrb[15].mxu0 }
 0x200   : > { %v4058_v20 = vadd.f32 %v6894_v24, %v4015_v3  ;;  %v5549_v8 = vadd.f32 %v3851_v15, %v6879_v11 }
 0x201   : > { %4095 = vst.msk [vmem:[%s6900_s16 + $0x68] sm:$0xff] %vm279_vm0, %v4059_v5  ;;  %v4018_v22 = vmul.f32 %v5548_v6, %v6889_v17 }
 0x202   : > { %4094 = vst.msk [vmem:[%s6900_s16 + $0x60] sm:$0xff] %vm279_vm0, %v4058_v20  ;;  %v4017_v26 = vmul.f32 %v5549_v8, %v6889_v17  ;;  %v5430_v28 = vpop.f32.mrb[16].mxu0 }
 0x203   : > { %v4061_v30 = vadd.f32 %v6894_v24, %v4018_v22  ;;  %v5550_v32 = vadd.f32 %v5430_v28, %v6881_v13  ;;  %v3861_v9 = vpop.f32.mrb[17].mxu0 }
 0x204   : > { %v4060_v34 = vadd.f32 %v6894_v24, %v4017_v26  ;;  %v5551_v36 = vadd.f32 %v3861_v9, %v6883_v14 }
 0x205   : > { %4097 = vst.msk [vmem:[%s6900_s16 + $0x78] sm:$0xff] %vm279_vm0, %v4061_v30  ;;  %v4020_v11 = vmul.f32 %v5550_v32, %v6889_v17 }
 0x206   : > { %v5185_v38 = vpop.f32.mrb[18].mxu1  ;;  %4096 = vst.msk [vmem:[%s6900_s16 + $0x70] sm:$0xff] %vm279_vm0, %v4060_v34  ;;  %v4019_v41 = vmul.f32 %v5551_v36, %v6889_v17  ;;  %v5433_v43 = vpop.f32.mrb[18].mxu0 }
 0x207   : > { %v2151_v45 = vpop.f32.mrb[19].mxu1  ;;  %v4063_v13 = vadd.f32 %v6894_v24, %v4020_v11  ;;  %v5552_v47 = vadd.f32 %v5433_v43, %v5185_v38  ;;  %v3871_v49 = vpop.f32.mrb[19].mxu0 }
 0x208   : > { %v4062_v50 = vadd.f32 %v6894_v24, %v4019_v41  ;;  %v5553_v14 = vadd.f32 %v3871_v49, %v2151_v45 }
 0x209   : > { %4099 = vst.msk [vmem:[%s6900_s16 + $0x88] sm:$0xff] %vm279_vm0, %v4063_v13  ;;  %v4022_v51 = vmul.f32 %v5552_v47, %v6889_v17 }
 0x20a   : > { %v5188_v53 = vpop.f32.mrb[20].mxu1  ;;  %4098 = vst.msk [vmem:[%s6900_s16 + $0x80] sm:$0xff] %vm279_vm0, %v4062_v50  ;;  %v4021_v10 = vmul.f32 %v5553_v14, %v6889_v17  ;;  %v5436_v55 = vpop.f32.mrb[20].mxu0 }
 0x20b   : > { %v2161_v56 = vpop.f32.mrb[21].mxu1  ;;  %v4065_v16 = vadd.f32 %v6894_v24, %v4022_v51  ;;  %v5554_v19 = vadd.f32 %v5436_v55, %v5188_v53  ;;  %v3881_v18 = vpop.f32.mrb[21].mxu0 }
 0x20c   : > { %v4064_v21 = vadd.f32 %v6894_v24, %v4021_v10  ;;  %v5555_v23 = vadd.f32 %v3881_v18, %v2161_v56 }
 0x20d   : > { %4101 = vst.msk [vmem:[%s6900_s16 + $0x98] sm:$0xff] %vm279_vm0, %v4065_v16  ;;  %v4024_v25 = vmul.f32 %v5554_v19, %v6889_v17 }
 0x20e   : > { %v5191_v27 = vpop.f32.mrb[22].mxu1  ;;  %4100 = vst.msk [vmem:[%s6900_s16 + $0x90] sm:$0xff] %vm279_vm0, %v4064_v21  ;;  %v4023_v29 = vmul.f32 %v5555_v23, %v6889_v17  ;;  %v5439_v31 = vpop.f32.mrb[22].mxu0 }
 0x20f   : > { %v2171_v33 = vpop.f32.mrb[23].mxu1  ;;  %v4067_v35 = vadd.f32 %v6894_v24, %v4024_v25  ;;  %v5556_v37 = vadd.f32 %v5439_v31, %v5191_v27  ;;  %v3891_v40 = vpop.f32.mrb[23].mxu0 }
 0x210   : > { %v4066_v42 = vadd.f32 %v6894_v24, %v4023_v29  ;;  %v5557_v44 = vadd.f32 %v3891_v40, %v2171_v33 }
 0x211   : > { %4103 = vst.msk [vmem:[%s6900_s16 + $0xa8] sm:$0xff] %vm279_vm0, %v4067_v35  ;;  %v4026_v57 = vmul.f32 %v5556_v37, %v6889_v17 }
 0x212   : > { %v5194_v46 = vpop.f32.mrb[24].mxu1  ;;  %4102 = vst.msk [vmem:[%s6900_s16 + $0xa0] sm:$0xff] %vm279_vm0, %v4066_v42  ;;  %v4025_v48 = vmul.f32 %v5557_v44, %v6889_v17  ;;  %v5442_v7 = vpop.f32.mrb[24].mxu0 }
 0x213   : > { %v2181_v58 = vpop.f32.mrb[25].mxu1  ;;  %v4069_v60 = vadd.f32 %v6894_v24, %v4026_v57  ;;  %v5558_v52 = vadd.f32 %v5442_v7, %v5194_v46  ;;  %v3901_v12 = vpop.f32.mrb[25].mxu0 }
 0x214   : > { %v4068_v54 = vadd.f32 %v6894_v24, %v4025_v48  ;;  %v5559_v59 = vadd.f32 %v3901_v12, %v2181_v58 }
 0x215   : > { %4105 = vst.msk [vmem:[%s6900_s16 + $0xb8] sm:$0xff] %vm279_vm0, %v4069_v60  ;;  %v4028_v61 = vmul.f32 %v5558_v52, %v6889_v17 }
 0x216   : > { %v5197_v62 = vpop.f32.mrb[26].mxu1  ;;  %4104 = vst.msk [vmem:[%s6900_s16 + $0xb0] sm:$0xff] %vm279_vm0, %v4068_v54  ;;  %v4027_v39 = vmul.f32 %v5559_v59, %v6889_v17  ;;  %v5445_v63 = vpop.f32.mrb[26].mxu0 }
 0x217   : > { %v2191_v0 = vpop.f32.mrb[27].mxu1  ;;  %v4071_v1 = vadd.f32 %v6894_v24, %v4028_v61  ;;  %v5560_v2 = vadd.f32 %v5445_v63, %v5197_v62  ;;  %v3911_v3 = vpop.f32.mrb[27].mxu0 }
 0x218   : > { %v4070_v4 = vadd.f32 %v6894_v24, %v4027_v39  ;;  %v5561_v5 = vadd.f32 %v3911_v3, %v2191_v0 }
 0x219   : > { %4107 = vst.msk [vmem:[%s6900_s16 + $0xc8] sm:$0xff] %vm279_vm0, %v4071_v1  ;;  %v4030_v6 = vmul.f32 %v5560_v2, %v6889_v17 }
 0x21a   : > { %v5200_v15 = vpop.f32.mrb[28].mxu1  ;;  %4106 = vst.msk [vmem:[%s6900_s16 + $0xc0] sm:$0xff] %vm279_vm0, %v4070_v4  ;;  %v4029_v20 = vmul.f32 %v5561_v5, %v6889_v17  ;;  %v5448_v8 = vpop.f32.mrb[28].mxu0 }
 0x21b   : > { %v2201_v22 = vpop.f32.mrb[29].mxu1  ;;  %v4073_v26 = vadd.f32 %v6894_v24, %v4030_v6  ;;  %v5562_v28 = vadd.f32 %v5448_v8, %v5200_v15  ;;  %v3921_v30 = vpop.f32.mrb[29].mxu0 }
 0x21c   : > { %v4072_v32 = vadd.f32 %v6894_v24, %v4029_v20  ;;  %v5563_v9 = vadd.f32 %v3921_v30, %v2201_v22 }
 0x21d   : > { %4109 = vst.msk [vmem:[%s6900_s16 + $0xd8] sm:$0xff] %vm279_vm0, %v4073_v26  ;;  %v4032_v34 = vmul.f32 %v5562_v28, %v6889_v17 }
 0x21e   : > { %v5203_v36 = vpop.f32.mrb[30].mxu1  ;;  %4108 = vst.msk [vmem:[%s6900_s16 + $0xd0] sm:$0xff] %vm279_vm0, %v4072_v32  ;;  %v4031_v11 = vmul.f32 %v5563_v9, %v6889_v17  ;;  %v5451_v38 = vpop.f32.mrb[30].mxu0 }
 0x21f   : > { %v2211_v41 = vpop.f32.mrb[31].mxu1  ;;  %v4075_v43 = vadd.f32 %v6894_v24, %v4032_v34  ;;  %v5564_v45 = vadd.f32 %v5451_v38, %v5203_v36  ;;  %v3931_v13 = vpop.f32.mrb[31].mxu0 }
 0x220   : > { %v4074_v47 = vadd.f32 %v6894_v24, %v4031_v11  ;;  %v5565_v49 = vadd.f32 %v3931_v13, %v2211_v41 }
 0x221   : > { %4111 = vst.msk [vmem:[%s6900_s16 + $0xe8] sm:$0xff] %vm279_vm0, %v4075_v43  ;;  %v4034_v50 = vmul.f32 %v5564_v45, %v6889_v17 }
 0x222   : > { %v5206_v14 = vpop.f32.mrb[32].mxu1  ;;  %4110 = vst.msk [vmem:[%s6900_s16 + $0xe0] sm:$0xff] %vm279_vm0, %v4074_v47  ;;  %v4033_v51 = vmul.f32 %v5565_v49, %v6889_v17  ;;  %v5454_v53 = vpop.f32.mrb[32].mxu0 }
 0x223   : > { %v2221_v10 = vpop.f32.mrb[33].mxu1  ;;  %v4077_v55 = vadd.f32 %v6894_v24, %v4034_v50  ;;  %v5566_v56 = vadd.f32 %v5454_v53, %v5206_v14  ;;  %v3941_v16 = vpop.f32.mrb[33].mxu0 }
 0x224   : > { %v4076_v19 = vadd.f32 %v6894_v24, %v4033_v51  ;;  %v5567_v18 = vadd.f32 %v3941_v16, %v2221_v10 }
 0x225   : > { %4113 = vst.msk [vmem:[%s6900_s16 + $0xf8] sm:$0xff] %vm279_vm0, %v4077_v55  ;;  %v4036_v21 = vmul.f32 %v5566_v56, %v6889_v17 }
 0x226   : > { %v5209_v23 = vpop.f32.mrb[34].mxu1  ;;  %4112 = vst.msk [vmem:[%s6900_s16 + $0xf0] sm:$0xff] %vm279_vm0, %v4076_v19  ;;  %v4035_v25 = vmul.f32 %v5567_v18, %v6889_v17  ;;  %v5457_v27 = vpop.f32.mrb[34].mxu0 }
 0x227   : > { %v2231_v29 = vpop.f32.mrb[35].mxu1  ;;  %v4079_v31 = vadd.f32 %v6894_v24, %v4036_v21  ;;  %v5568_v33 = vadd.f32 %v5457_v27, %v5209_v23  ;;  %v3951_v35 = vpop.f32.mrb[35].mxu0 }
 0x228   : > { %v4078_v37 = vadd.f32 %v6894_v24, %v4035_v25  ;;  %v5569_v40 = vadd.f32 %v3951_v35, %v2231_v29 }
 0x229   : > { %4115 = vst.msk [vmem:[%s6900_s16 + $0x108] sm:$0xff] %vm279_vm0, %v4079_v31  ;;  %v4038_v42 = vmul.f32 %v5568_v33, %v6889_v17 }
 0x22a   : > { %4114 = vst.msk [vmem:[%s6900_s16 + $0x100] sm:$0xff] %vm279_vm0, %v4078_v37  ;;  %v4037_v44 = vmul.f32 %v5569_v40, %v6889_v17 }
 0x22b   : > { %v4081_v57 = vadd.f32 %v6894_v24, %v4038_v42 }
 0x22c   : > { %v4080_v46 = vadd.f32 %v6894_v24, %v4037_v44 }
 0x22d   : > { %4117 = vst.msk [vmem:[%s6900_s16 + $0x118] sm:$0xff] %vm279_vm0, %v4081_v57 }
 0x22e   : > { %4116 = vst.msk [vmem:[%s6900_s16 + $0x110] sm:$0xff] %vm279_vm0, %v4080_v46 }
 0x22f PF: > { %s14_s15 = sadd.s32 1, %s5838_s15  }
 0x230   : > { %p11_p4 = scmp.ge.s32.totalorder %s14_s15, 4  }
 0x232   :  { %13 = sbr.rel (!%p11_p4) target bundleno = 1 (0x1), region = 74 }

</bundles_post_ra>
